<compile_context>
chip_gen: v5e
topology: v5e:2x2
jax: 0.10.0
libtpu: 0.0.40
codegen_flags: <defaults>
</compile_context>

<pallas_src>
import jax
import jax.numpy as jnp
import numpy as np
from jax import lax
from jax.experimental import pallas as pl
from jax.experimental.pallas import tpu as pltpu

H, W = 10, 20               # fixed by cc.CLayerNorm([10, 20])
PH, PW = H + 2, W + 2       # zero-padded spatial dims (12, 22)
PF = PH * PW                # 264 flattened padded pixels
S = 384                     # lane-padded width (multiple of 128), >= PF + 23
EPS = 1e-5
# flat-index offsets of the 9 taps of a 3x3 kernel, in (dy, dx) order
TAP_OFFSETS = tuple((dy - 1) * PW + (dx - 1) for dy in range(3) for dx in range(3))


# ----------------------------- Pallas kernel ------------------------------- #

def _conv3x3(v, w_ref, b_ref, mask2d):
    """3x3 SAME conv on one sample.  v: (C, S) with zero border -> (C, S), zero border."""
    # im2col: 9 lane-shifted copies (XLU rolls; wrapped lanes only land where the
    # mask is zero) stacked along sublanes -> one MXU matmul with K = 9*C.
    shifted = [v if d == 0 else pltpu.roll(v, shift=(-d) % S, axis=1)
               for d in TAP_OFFSETS]
    slab = jnp.concatenate(shifted, axis=0)                        # (9C, S)
    out = jnp.dot(w_ref[...], slab, preferred_element_type=jnp.float32)
    return (out + b_ref[...]) * mask2d


def _resblock(v, wa_ref, ba_ref, wb_ref, bb_ref, mask2d):
    h = jnp.maximum(_conv3x3(v, wa_ref, ba_ref, mask2d), 0.0)
    h = _conv3x3(h, wb_ref, bb_ref, mask2d)
    return jnp.maximum(h + v, 0.0)


def slit_kernel(x_ref, mask_ref, g_ref, beta_ref,
                w1a_ref, b1a_ref, w1b_ref, b1b_ref,
                w2a_ref, b2a_ref, w2b_ref, b2b_ref,
                o_ref):
    x = x_ref[...].astype(jnp.float32)          # (B, C, S), zero border / guard lanes
    maskb = mask_ref[...]                       # (1, C, S), 1.0 on interior pixels
    mask2d = maskb[0]                           # (C, S)  (hoisted; reused by all convs)

    # --- LayerNorm over the (10, 20) spatial positions, per (n, c) ----------
    # Border and guard lanes are exactly zero, so plain lane-sums / (H*W) give
    # the masked statistics; only the final output needs masking.
    inv_n = 1.0 / float(H * W)
    mean = jnp.sum(x, axis=-1, keepdims=True) * inv_n              # (B, C, 1)
    ex2 = jnp.sum(x * x, axis=-1, keepdims=True) * inv_n
    var = ex2 - mean * mean
    y = ((x - mean) * lax.rsqrt(var + EPS) * g_ref[...] + beta_ref[...]) * maskb

    # --- two residual conv blocks, per sample (static unroll over the block) --
    for bi in range(x.shape[0]):
        v = y[bi]                                                  # (C, S)
        v = _resblock(v, w1a_ref, b1a_ref, w1b_ref, b1b_ref, mask2d)
        v = _resblock(v, w2a_ref, b2a_ref, w2b_ref, b2b_ref, mask2d)
        o_ref[bi] = v.astype(o_ref.dtype)                          # dense 384-lane store


# ----------------------------- wrapper (glue) ------------------------------ #

def slit_layer(x_nchw, params, *, block_batch=None):
    n, c, h, w = x_nchw.shape
    assert (h, w) == (H, W), "spatial size fixed to 10x20 by CLayerNorm([10, 20])"

    # Samples per grid step: amortize per-step overhead, but keep >= 2 grid steps
    # whenever the batch allows it (v7x has 2 TensorCores).
    if block_batch is None:
        block_batch = min(8, max(1, (n + 1) // 2))
    steps = -(-n // block_batch)
    n_pad = steps * block_batch

    # NCHW -> (N, C, S): zero-pad spatial to 12x22, flatten, pad lanes to 384.
    xf = jnp.pad(x_nchw.astype(jnp.float32),
                 ((0, n_pad - n), (0, 0), (1, 1), (1, 1)))
    x_lanes = jnp.pad(xf.reshape(n_pad, c, PF), ((0, 0), (0, 0), (0, S - PF)))

    def flat_spatial(p2d):                      # (H, W) -> (1, 1, S)
        fp = jnp.pad(p2d.astype(jnp.float32), ((1, 1), (1, 1))).reshape(1, 1, PF)
        return jnp.pad(fp, ((0, 0), (0, 0), (0, S - PF)))

    # Broadcasts hoisted into the wrapper: mask already (1, C, S), biases (C, 1).
    mask = jnp.broadcast_to(flat_spatial(jnp.ones((H, W), jnp.float32)), (1, c, S))
    gamma = flat_spatial(params["ln_gamma"])
    beta = flat_spatial(params["ln_beta"])

    def w_flat(key):   # (3, 3, Cin, Cout) -> (Cout, 9*Cin), tap-major / ci-minor
        return jnp.transpose(params[key], (3, 0, 1, 2)).reshape(c, 9 * c).astype(jnp.float32)

    def b_col(key):
        return params[key].reshape(c, 1).astype(jnp.float32)

    args = (x_lanes, mask, gamma, beta,
            w_flat("w1a"), b_col("b1a"), w_flat("w1b"), b_col("b1b"),
            w_flat("w2a"), b_col("b2a"), w_flat("w2b"), b_col("b2b"))

    def const_spec(a):
        nd = a.ndim
        return pl.BlockSpec(a.shape, lambda i, _nd=nd: (0,) * _nd)

    in_specs = [pl.BlockSpec((block_batch, c, S), lambda i: (i, 0, 0))]
    in_specs += [const_spec(a) for a in args[1:]]

    out_lanes = pl.pallas_call(
        slit_kernel,
        out_shape=jax.ShapeDtypeStruct((n_pad, c, S), jnp.float32),
        grid=(steps,),
        in_specs=in_specs,
        out_specs=pl.BlockSpec((block_batch, c, S), lambda i: (i, 0, 0)),
        compiler_params=pltpu.CompilerParams(
            dimension_semantics=("parallel",)),
    )(*args)

    # Output is already channel-major: crop guard lanes / padded batch, no transpose.
    out = out_lanes[:n, :, :PF].reshape(n, c, PH, PW)[:, :, 1:H + 1, 1:W + 1]
    return out


# ----------------------------- pure-JAX reference -------------------------- #

def reference_forward(x, params):
    mean = x.mean(axis=(2, 3), keepdims=True)
    var = ((x - mean) ** 2).mean(axis=(2, 3), keepdims=True)
    y = (x - mean) / jnp.sqrt(var + EPS)
    y = y * params["ln_gamma"][None, None] + params["ln_beta"][None, None]

    def conv(z, w_, b_):
        o = lax.conv_general_dilated(
            z, w_, window_strides=(1, 1), padding="SAME",
            dimension_numbers=("NCHW", "HWIO", "NCHW"),
            precision=lax.Precision.HIGHEST)
        return o + b_.reshape(1, -1, 1, 1)

    def block(z, wa, ba, wb, bb):
        hh = jnp.maximum(conv(z, wa, ba), 0.0)
        hh = conv(hh, wb, bb)
        return jnp.maximum(hh + z, 0.0)

    y = block(y, params["w1a"], params["b1a"], params["w1b"], params["b1b"])
    y = block(y, params["w2a"], params["b2a"], params["w2b"], params["b2b"])
    return y


# ----------------------------------- main ----------------------------------- #

if __name__ == "__main__":
    N, C = 4, 8                                   # batch, hidden_channel
    key = jax.random.PRNGKey(0)
    ks = jax.random.split(key, 12)
    x = jax.random.normal(ks[0], (N, C, H, W), jnp.float32)

    def rnd(k, shape, scale=0.1):
        return scale * jax.random.normal(k, shape, jnp.float32)

    params = {
        "ln_gamma": 1.0 + rnd(ks[9], (H, W)),
        "ln_beta": rnd(ks[10], (H, W)),
        "w1a": rnd(ks[1], (3, 3, C, C)), "b1a": rnd(ks[2], (C,)),
        "w1b": rnd(ks[3], (3, 3, C, C)), "b1b": rnd(ks[4], (C,)),
        "w2a": rnd(ks[5], (3, 3, C, C)), "b2a": rnd(ks[6], (C,)),
        "w2b": rnd(ks[7], (3, 3, C, C)), "b2b": rnd(ks[8], (C,)),
    }

    out = jax.block_until_ready(slit_layer(x, params))
    ref = jax.block_until_ready(reference_forward(x, params))
    assert out.shape == (N, C, H, W), out.shape
    np.testing.assert_allclose(np.asarray(out), np.asarray(ref),
                               rtol=2e-2, atol=2e-2)
    print("KERNEL_OK")
</pallas_src>

<mosaic_0001>
module attributes {stable_mosaic.version = 11 : i64} {
  func.func @slit_kernel(%arg0: i32, %arg1: memref<2x8x384xf32, #tpu.memory_space<vmem>>, %arg2: memref<1x8x384xf32, #tpu.memory_space<vmem>>, %arg3: memref<1x1x384xf32, #tpu.memory_space<vmem>>, %arg4: memref<1x1x384xf32, #tpu.memory_space<vmem>>, %arg5: memref<8x72xf32, #tpu.memory_space<vmem>>, %arg6: memref<8x1xf32, #tpu.memory_space<vmem>>, %arg7: memref<8x72xf32, #tpu.memory_space<vmem>>, %arg8: memref<8x1xf32, #tpu.memory_space<vmem>>, %arg9: memref<8x72xf32, #tpu.memory_space<vmem>>, %arg10: memref<8x1xf32, #tpu.memory_space<vmem>>, %arg11: memref<8x72xf32, #tpu.memory_space<vmem>>, %arg12: memref<8x1xf32, #tpu.memory_space<vmem>>, %arg13: memref<2x8x384xf32, #tpu.memory_space<vmem>>) attributes {dimension_semantics = [#tpu.dimension_semantics<parallel>], iteration_bounds = array<i64: 2>, scalar_prefetch = 0 : i64, scratch_operands = 0 : i64, tpu.core_type = #tpu.core_type<tc>, window_params = [{transform_indices = @transform_0, window_bounds = array<i64: 2, 8, 384>}, {pipeline_mode = #tpu.pipeline_mode<synchronous>, transform_indices = @transform_1, window_bounds = array<i64: 1, 8, 384>}, {pipeline_mode = #tpu.pipeline_mode<synchronous>, transform_indices = @transform_2, window_bounds = array<i64: 1, 1, 384>}, {pipeline_mode = #tpu.pipeline_mode<synchronous>, transform_indices = @transform_3, window_bounds = array<i64: 1, 1, 384>}, {pipeline_mode = #tpu.pipeline_mode<synchronous>, transform_indices = @transform_4, window_bounds = array<i64: 8, 72>}, {pipeline_mode = #tpu.pipeline_mode<synchronous>, transform_indices = @transform_5, window_bounds = array<i64: 8, 1>}, {pipeline_mode = #tpu.pipeline_mode<synchronous>, transform_indices = @transform_6, window_bounds = array<i64: 8, 72>}, {pipeline_mode = #tpu.pipeline_mode<synchronous>, transform_indices = @transform_7, window_bounds = array<i64: 8, 1>}, {pipeline_mode = #tpu.pipeline_mode<synchronous>, transform_indices = @transform_8, window_bounds = array<i64: 8, 72>}, {pipeline_mode = #tpu.pipeline_mode<synchronous>, transform_indices = @transform_9, window_bounds = array<i64: 8, 1>}, {pipeline_mode = #tpu.pipeline_mode<synchronous>, transform_indices = @transform_10, window_bounds = array<i64: 8, 72>}, {pipeline_mode = #tpu.pipeline_mode<synchronous>, transform_indices = @transform_11, window_bounds = array<i64: 8, 1>}, {transform_indices = @transform_12, window_bounds = array<i64: 2, 8, 384>}]} {
    %c0 = arith.constant 0 : index
    %c0_0 = arith.constant 0 : index
    %c0_1 = arith.constant 0 : index
    %0 = vector.load %arg1[%c0, %c0_0, %c0_1] : memref<2x8x384xf32, #tpu.memory_space<vmem>>, vector<2x8x384xf32>
    %c0_2 = arith.constant 0 : index
    %c0_3 = arith.constant 0 : index
    %c0_4 = arith.constant 0 : index
    %1 = vector.load %arg2[%c0_2, %c0_3, %c0_4] : memref<1x8x384xf32, #tpu.memory_space<vmem>>, vector<1x8x384xf32>
    %2 = vector.shape_cast %1 : vector<1x8x384xf32> to vector<8x384xf32>
    %cst = arith.constant dense<0.000000e+00> : vector<2x8xf32>
    %3 = vector.multi_reduction <add>, %0, %cst [2] : vector<2x8x384xf32> to vector<2x8xf32>
    %4 = vector.shape_cast %3 : vector<2x8xf32> to vector<2x8x1xf32>
    %cst_5 = arith.constant 5.000000e-03 : f32
    %5 = vector.broadcast %cst_5 : f32 to vector<2x8x1xf32>
    %6 = arith.mulf %4, %5 : vector<2x8x1xf32>
    %7 = arith.mulf %0, %0 : vector<2x8x384xf32>
    %cst_6 = arith.constant dense<0.000000e+00> : vector<2x8xf32>
    %8 = vector.multi_reduction <add>, %7, %cst_6 [2] : vector<2x8x384xf32> to vector<2x8xf32>
    %9 = vector.shape_cast %8 : vector<2x8xf32> to vector<2x8x1xf32>
    %cst_7 = arith.constant 5.000000e-03 : f32
    %10 = vector.broadcast %cst_7 : f32 to vector<2x8x1xf32>
    %11 = arith.mulf %9, %10 : vector<2x8x1xf32>
    %12 = arith.mulf %6, %6 : vector<2x8x1xf32>
    %13 = arith.subf %11, %12 : vector<2x8x1xf32>
    %14 = vector.broadcast %6 : vector<2x8x1xf32> to vector<2x8x384xf32>
    %15 = arith.subf %0, %14 : vector<2x8x384xf32>
    %cst_8 = arith.constant 9.99999974E-6 : f32
    %16 = vector.broadcast %cst_8 : f32 to vector<2x8x1xf32>
    %17 = arith.addf %13, %16 : vector<2x8x1xf32>
    %18 = math.rsqrt %17 : vector<2x8x1xf32>
    %19 = vector.broadcast %18 : vector<2x8x1xf32> to vector<2x8x384xf32>
    %20 = arith.mulf %15, %19 : vector<2x8x384xf32>
    %c0_9 = arith.constant 0 : index
    %c0_10 = arith.constant 0 : index
    %c0_11 = arith.constant 0 : index
    %21 = vector.load %arg3[%c0_9, %c0_10, %c0_11] : memref<1x1x384xf32, #tpu.memory_space<vmem>>, vector<1x1x384xf32>
    %22 = vector.broadcast %21 : vector<1x1x384xf32> to vector<2x8x384xf32>
    %23 = arith.mulf %20, %22 : vector<2x8x384xf32>
    %c0_12 = arith.constant 0 : index
    %c0_13 = arith.constant 0 : index
    %c0_14 = arith.constant 0 : index
    %24 = vector.load %arg4[%c0_12, %c0_13, %c0_14] : memref<1x1x384xf32, #tpu.memory_space<vmem>>, vector<1x1x384xf32>
    %25 = vector.broadcast %24 : vector<1x1x384xf32> to vector<2x8x384xf32>
    %26 = arith.addf %23, %25 : vector<2x8x384xf32>
    %27 = vector.broadcast %1 : vector<1x8x384xf32> to vector<2x8x384xf32>
    %28 = arith.mulf %26, %27 : vector<2x8x384xf32>
    %29 = vector.extract_strided_slice %28 {offsets = [0, 0, 0], sizes = [1, 8, 384], strides = [1, 1, 1]} : vector<2x8x384xf32> to vector<1x8x384xf32>
    %30 = vector.shape_cast %29 : vector<1x8x384xf32> to vector<8x384xf32>
    %c23_i32 = arith.constant 23 : i32
    %31 = tpu.dynamic_rotate %30 by %c23_i32 dim 1 : vector<8x384xf32>, i32 -> vector<8x384xf32>
    %c22_i32 = arith.constant 22 : i32
    %32 = tpu.dynamic_rotate %30 by %c22_i32 dim 1 : vector<8x384xf32>, i32 -> vector<8x384xf32>
    %c21_i32 = arith.constant 21 : i32
    %33 = tpu.dynamic_rotate %30 by %c21_i32 dim 1 : vector<8x384xf32>, i32 -> vector<8x384xf32>
    %c1_i32 = arith.constant 1 : i32
    %34 = tpu.dynamic_rotate %30 by %c1_i32 dim 1 : vector<8x384xf32>, i32 -> vector<8x384xf32>
    %c383_i32 = arith.constant 383 : i32
    %35 = tpu.dynamic_rotate %30 by %c383_i32 dim 1 : vector<8x384xf32>, i32 -> vector<8x384xf32>
    %c363_i32 = arith.constant 363 : i32
    %36 = tpu.dynamic_rotate %30 by %c363_i32 dim 1 : vector<8x384xf32>, i32 -> vector<8x384xf32>
    %c362_i32 = arith.constant 362 : i32
    %37 = tpu.dynamic_rotate %30 by %c362_i32 dim 1 : vector<8x384xf32>, i32 -> vector<8x384xf32>
    %c361_i32 = arith.constant 361 : i32
    %38 = tpu.dynamic_rotate %30 by %c361_i32 dim 1 : vector<8x384xf32>, i32 -> vector<8x384xf32>
    %39 = tpu.concatenate %31, %32, %33, %34, %30, %35, %36, %37, %38 in 0 : vector<8x384xf32>, vector<8x384xf32>, vector<8x384xf32>, vector<8x384xf32>, vector<8x384xf32>, vector<8x384xf32>, vector<8x384xf32>, vector<8x384xf32>, vector<8x384xf32> -> vector<72x384xf32>
    %c0_15 = arith.constant 0 : index
    %c0_16 = arith.constant 0 : index
    %40 = vector.load %arg5[%c0_15, %c0_16] : memref<8x72xf32, #tpu.memory_space<vmem>>, vector<8x72xf32>
    %cst_17 = arith.constant dense<0.000000e+00> : vector<8x384xf32>
    %41 = tpu.matmul %40, %39, %cst_17 {dimension_numbers = #tpu.dot_dimension_numbers<[1], [0], [0], [1], [0, 0, 1, 1], [], []>} : vector<8x72xf32>, vector<72x384xf32>, vector<8x384xf32> -> vector<8x384xf32>
    %c0_18 = arith.constant 0 : index
    %c0_19 = arith.constant 0 : index
    %42 = vector.load %arg6[%c0_18, %c0_19] : memref<8x1xf32, #tpu.memory_space<vmem>>, vector<8x1xf32>
    %43 = vector.broadcast %42 : vector<8x1xf32> to vector<8x384xf32>
    %44 = arith.addf %41, %43 : vector<8x384xf32>
    %45 = arith.mulf %44, %2 : vector<8x384xf32>
    %cst_20 = arith.constant 0.000000e+00 : f32
    %46 = vector.broadcast %cst_20 : f32 to vector<8x384xf32>
    %47 = arith.maximumf %45, %46 : vector<8x384xf32>
    %c23_i32_21 = arith.constant 23 : i32
    %48 = tpu.dynamic_rotate %47 by %c23_i32_21 dim 1 : vector<8x384xf32>, i32 -> vector<8x384xf32>
    %c22_i32_22 = arith.constant 22 : i32
    %49 = tpu.dynamic_rotate %47 by %c22_i32_22 dim 1 : vector<8x384xf32>, i32 -> vector<8x384xf32>
    %c21_i32_23 = arith.constant 21 : i32
    %50 = tpu.dynamic_rotate %47 by %c21_i32_23 dim 1 : vector<8x384xf32>, i32 -> vector<8x384xf32>
    %c1_i32_24 = arith.constant 1 : i32
    %51 = tpu.dynamic_rotate %47 by %c1_i32_24 dim 1 : vector<8x384xf32>, i32 -> vector<8x384xf32>
    %c383_i32_25 = arith.constant 383 : i32
    %52 = tpu.dynamic_rotate %47 by %c383_i32_25 dim 1 : vector<8x384xf32>, i32 -> vector<8x384xf32>
    %c363_i32_26 = arith.constant 363 : i32
    %53 = tpu.dynamic_rotate %47 by %c363_i32_26 dim 1 : vector<8x384xf32>, i32 -> vector<8x384xf32>
    %c362_i32_27 = arith.constant 362 : i32
    %54 = tpu.dynamic_rotate %47 by %c362_i32_27 dim 1 : vector<8x384xf32>, i32 -> vector<8x384xf32>
    %c361_i32_28 = arith.constant 361 : i32
    %55 = tpu.dynamic_rotate %47 by %c361_i32_28 dim 1 : vector<8x384xf32>, i32 -> vector<8x384xf32>
    %56 = tpu.concatenate %48, %49, %50, %51, %47, %52, %53, %54, %55 in 0 : vector<8x384xf32>, vector<8x384xf32>, vector<8x384xf32>, vector<8x384xf32>, vector<8x384xf32>, vector<8x384xf32>, vector<8x384xf32>, vector<8x384xf32>, vector<8x384xf32> -> vector<72x384xf32>
    %c0_29 = arith.constant 0 : index
    %c0_30 = arith.constant 0 : index
    %57 = vector.load %arg7[%c0_29, %c0_30] : memref<8x72xf32, #tpu.memory_space<vmem>>, vector<8x72xf32>
    %cst_31 = arith.constant dense<0.000000e+00> : vector<8x384xf32>
    %58 = tpu.matmul %57, %56, %cst_31 {dimension_numbers = #tpu.dot_dimension_numbers<[1], [0], [0], [1], [0, 0, 1, 1], [], []>} : vector<8x72xf32>, vector<72x384xf32>, vector<8x384xf32> -> vector<8x384xf32>
    %c0_32 = arith.constant 0 : index
    %c0_33 = arith.constant 0 : index
    %59 = vector.load %arg8[%c0_32, %c0_33] : memref<8x1xf32, #tpu.memory_space<vmem>>, vector<8x1xf32>
    %60 = vector.broadcast %59 : vector<8x1xf32> to vector<8x384xf32>
    %61 = arith.addf %58, %60 : vector<8x384xf32>
    %62 = arith.mulf %61, %2 : vector<8x384xf32>
    %63 = arith.addf %62, %30 : vector<8x384xf32>
    %cst_34 = arith.constant 0.000000e+00 : f32
    %64 = vector.broadcast %cst_34 : f32 to vector<8x384xf32>
    %65 = arith.maximumf %63, %64 : vector<8x384xf32>
    %c23_i32_35 = arith.constant 23 : i32
    %66 = tpu.dynamic_rotate %65 by %c23_i32_35 dim 1 : vector<8x384xf32>, i32 -> vector<8x384xf32>
    %c22_i32_36 = arith.constant 22 : i32
    %67 = tpu.dynamic_rotate %65 by %c22_i32_36 dim 1 : vector<8x384xf32>, i32 -> vector<8x384xf32>
    %c21_i32_37 = arith.constant 21 : i32
    %68 = tpu.dynamic_rotate %65 by %c21_i32_37 dim 1 : vector<8x384xf32>, i32 -> vector<8x384xf32>
    %c1_i32_38 = arith.constant 1 : i32
    %69 = tpu.dynamic_rotate %65 by %c1_i32_38 dim 1 : vector<8x384xf32>, i32 -> vector<8x384xf32>
    %c383_i32_39 = arith.constant 383 : i32
    %70 = tpu.dynamic_rotate %65 by %c383_i32_39 dim 1 : vector<8x384xf32>, i32 -> vector<8x384xf32>
    %c363_i32_40 = arith.constant 363 : i32
    %71 = tpu.dynamic_rotate %65 by %c363_i32_40 dim 1 : vector<8x384xf32>, i32 -> vector<8x384xf32>
    %c362_i32_41 = arith.constant 362 : i32
    %72 = tpu.dynamic_rotate %65 by %c362_i32_41 dim 1 : vector<8x384xf32>, i32 -> vector<8x384xf32>
    %c361_i32_42 = arith.constant 361 : i32
    %73 = tpu.dynamic_rotate %65 by %c361_i32_42 dim 1 : vector<8x384xf32>, i32 -> vector<8x384xf32>
    %74 = tpu.concatenate %66, %67, %68, %69, %65, %70, %71, %72, %73 in 0 : vector<8x384xf32>, vector<8x384xf32>, vector<8x384xf32>, vector<8x384xf32>, vector<8x384xf32>, vector<8x384xf32>, vector<8x384xf32>, vector<8x384xf32>, vector<8x384xf32> -> vector<72x384xf32>
    %c0_43 = arith.constant 0 : index
    %c0_44 = arith.constant 0 : index
    %75 = vector.load %arg9[%c0_43, %c0_44] : memref<8x72xf32, #tpu.memory_space<vmem>>, vector<8x72xf32>
    %cst_45 = arith.constant dense<0.000000e+00> : vector<8x384xf32>
    %76 = tpu.matmul %75, %74, %cst_45 {dimension_numbers = #tpu.dot_dimension_numbers<[1], [0], [0], [1], [0, 0, 1, 1], [], []>} : vector<8x72xf32>, vector<72x384xf32>, vector<8x384xf32> -> vector<8x384xf32>
    %c0_46 = arith.constant 0 : index
    %c0_47 = arith.constant 0 : index
    %77 = vector.load %arg10[%c0_46, %c0_47] : memref<8x1xf32, #tpu.memory_space<vmem>>, vector<8x1xf32>
    %78 = vector.broadcast %77 : vector<8x1xf32> to vector<8x384xf32>
    %79 = arith.addf %76, %78 : vector<8x384xf32>
    %80 = arith.mulf %79, %2 : vector<8x384xf32>
    %cst_48 = arith.constant 0.000000e+00 : f32
    %81 = vector.broadcast %cst_48 : f32 to vector<8x384xf32>
    %82 = arith.maximumf %80, %81 : vector<8x384xf32>
    %c23_i32_49 = arith.constant 23 : i32
    %83 = tpu.dynamic_rotate %82 by %c23_i32_49 dim 1 : vector<8x384xf32>, i32 -> vector<8x384xf32>
    %c22_i32_50 = arith.constant 22 : i32
    %84 = tpu.dynamic_rotate %82 by %c22_i32_50 dim 1 : vector<8x384xf32>, i32 -> vector<8x384xf32>
    %c21_i32_51 = arith.constant 21 : i32
    %85 = tpu.dynamic_rotate %82 by %c21_i32_51 dim 1 : vector<8x384xf32>, i32 -> vector<8x384xf32>
    %c1_i32_52 = arith.constant 1 : i32
    %86 = tpu.dynamic_rotate %82 by %c1_i32_52 dim 1 : vector<8x384xf32>, i32 -> vector<8x384xf32>
    %c383_i32_53 = arith.constant 383 : i32
    %87 = tpu.dynamic_rotate %82 by %c383_i32_53 dim 1 : vector<8x384xf32>, i32 -> vector<8x384xf32>
    %c363_i32_54 = arith.constant 363 : i32
    %88 = tpu.dynamic_rotate %82 by %c363_i32_54 dim 1 : vector<8x384xf32>, i32 -> vector<8x384xf32>
    %c362_i32_55 = arith.constant 362 : i32
    %89 = tpu.dynamic_rotate %82 by %c362_i32_55 dim 1 : vector<8x384xf32>, i32 -> vector<8x384xf32>
    %c361_i32_56 = arith.constant 361 : i32
    %90 = tpu.dynamic_rotate %82 by %c361_i32_56 dim 1 : vector<8x384xf32>, i32 -> vector<8x384xf32>
    %91 = tpu.concatenate %83, %84, %85, %86, %82, %87, %88, %89, %90 in 0 : vector<8x384xf32>, vector<8x384xf32>, vector<8x384xf32>, vector<8x384xf32>, vector<8x384xf32>, vector<8x384xf32>, vector<8x384xf32>, vector<8x384xf32>, vector<8x384xf32> -> vector<72x384xf32>
    %c0_57 = arith.constant 0 : index
    %c0_58 = arith.constant 0 : index
    %92 = vector.load %arg11[%c0_57, %c0_58] : memref<8x72xf32, #tpu.memory_space<vmem>>, vector<8x72xf32>
    %cst_59 = arith.constant dense<0.000000e+00> : vector<8x384xf32>
    %93 = tpu.matmul %92, %91, %cst_59 {dimension_numbers = #tpu.dot_dimension_numbers<[1], [0], [0], [1], [0, 0, 1, 1], [], []>} : vector<8x72xf32>, vector<72x384xf32>, vector<8x384xf32> -> vector<8x384xf32>
    %c0_60 = arith.constant 0 : index
    %c0_61 = arith.constant 0 : index
    %94 = vector.load %arg12[%c0_60, %c0_61] : memref<8x1xf32, #tpu.memory_space<vmem>>, vector<8x1xf32>
    %95 = vector.broadcast %94 : vector<8x1xf32> to vector<8x384xf32>
    %96 = arith.addf %93, %95 : vector<8x384xf32>
    %97 = arith.mulf %96, %2 : vector<8x384xf32>
    %98 = arith.addf %97, %65 : vector<8x384xf32>
    %cst_62 = arith.constant 0.000000e+00 : f32
    %99 = vector.broadcast %cst_62 : f32 to vector<8x384xf32>
    %100 = arith.maximumf %98, %99 : vector<8x384xf32>
    %c0_63 = arith.constant 0 : index
    %c0_64 = arith.constant 0 : index
    %c0_65 = arith.constant 0 : index
    %101 = vector.load %arg13[%c0_63, %c0_64, %c0_65] : memref<2x8x384xf32, #tpu.memory_space<vmem>>, vector<1x8x384xf32>
    %102 = vector.shape_cast %101 : vector<1x8x384xf32> to vector<8x384xf32>
    %103 = vector.shape_cast %100 : vector<8x384xf32> to vector<1x8x384xf32>
    tpu.vector_store %arg13[%c0_63, %c0_64, %c0_65], %103 {strides = array<i32>} : memref<2x8x384xf32, #tpu.memory_space<vmem>>, vector<1x8x384xf32>,
    %104 = vector.extract_strided_slice %28 {offsets = [1, 0, 0], sizes = [1, 8, 384], strides = [1, 1, 1]} : vector<2x8x384xf32> to vector<1x8x384xf32>
    %105 = vector.shape_cast %104 : vector<1x8x384xf32> to vector<8x384xf32>
    %c23_i32_66 = arith.constant 23 : i32
    %106 = tpu.dynamic_rotate %105 by %c23_i32_66 dim 1 : vector<8x384xf32>, i32 -> vector<8x384xf32>
    %c22_i32_67 = arith.constant 22 : i32
    %107 = tpu.dynamic_rotate %105 by %c22_i32_67 dim 1 : vector<8x384xf32>, i32 -> vector<8x384xf32>
    %c21_i32_68 = arith.constant 21 : i32
    %108 = tpu.dynamic_rotate %105 by %c21_i32_68 dim 1 : vector<8x384xf32>, i32 -> vector<8x384xf32>
    %c1_i32_69 = arith.constant 1 : i32
    %109 = tpu.dynamic_rotate %105 by %c1_i32_69 dim 1 : vector<8x384xf32>, i32 -> vector<8x384xf32>
    %c383_i32_70 = arith.constant 383 : i32
    %110 = tpu.dynamic_rotate %105 by %c383_i32_70 dim 1 : vector<8x384xf32>, i32 -> vector<8x384xf32>
    %c363_i32_71 = arith.constant 363 : i32
    %111 = tpu.dynamic_rotate %105 by %c363_i32_71 dim 1 : vector<8x384xf32>, i32 -> vector<8x384xf32>
    %c362_i32_72 = arith.constant 362 : i32
    %112 = tpu.dynamic_rotate %105 by %c362_i32_72 dim 1 : vector<8x384xf32>, i32 -> vector<8x384xf32>
    %c361_i32_73 = arith.constant 361 : i32
    %113 = tpu.dynamic_rotate %105 by %c361_i32_73 dim 1 : vector<8x384xf32>, i32 -> vector<8x384xf32>
    %114 = tpu.concatenate %106, %107, %108, %109, %105, %110, %111, %112, %113 in 0 : vector<8x384xf32>, vector<8x384xf32>, vector<8x384xf32>, vector<8x384xf32>, vector<8x384xf32>, vector<8x384xf32>, vector<8x384xf32>, vector<8x384xf32>, vector<8x384xf32> -> vector<72x384xf32>
    %c0_74 = arith.constant 0 : index
    %c0_75 = arith.constant 0 : index
    %115 = vector.load %arg5[%c0_74, %c0_75] : memref<8x72xf32, #tpu.memory_space<vmem>>, vector<8x72xf32>
    %cst_76 = arith.constant dense<0.000000e+00> : vector<8x384xf32>
    %116 = tpu.matmul %115, %114, %cst_76 {dimension_numbers = #tpu.dot_dimension_numbers<[1], [0], [0], [1], [0, 0, 1, 1], [], []>} : vector<8x72xf32>, vector<72x384xf32>, vector<8x384xf32> -> vector<8x384xf32>
    %c0_77 = arith.constant 0 : index
    %c0_78 = arith.constant 0 : index
    %117 = vector.load %arg6[%c0_77, %c0_78] : memref<8x1xf32, #tpu.memory_space<vmem>>, vector<8x1xf32>
    %118 = vector.broadcast %117 : vector<8x1xf32> to vector<8x384xf32>
    %119 = arith.addf %116, %118 : vector<8x384xf32>
    %120 = arith.mulf %119, %2 : vector<8x384xf32>
    %cst_79 = arith.constant 0.000000e+00 : f32
    %121 = vector.broadcast %cst_79 : f32 to vector<8x384xf32>
    %122 = arith.maximumf %120, %121 : vector<8x384xf32>
    %c23_i32_80 = arith.constant 23 : i32
    %123 = tpu.dynamic_rotate %122 by %c23_i32_80 dim 1 : vector<8x384xf32>, i32 -> vector<8x384xf32>
    %c22_i32_81 = arith.constant 22 : i32
    %124 = tpu.dynamic_rotate %122 by %c22_i32_81 dim 1 : vector<8x384xf32>, i32 -> vector<8x384xf32>
    %c21_i32_82 = arith.constant 21 : i32
    %125 = tpu.dynamic_rotate %122 by %c21_i32_82 dim 1 : vector<8x384xf32>, i32 -> vector<8x384xf32>
    %c1_i32_83 = arith.constant 1 : i32
    %126 = tpu.dynamic_rotate %122 by %c1_i32_83 dim 1 : vector<8x384xf32>, i32 -> vector<8x384xf32>
    %c383_i32_84 = arith.constant 383 : i32
    %127 = tpu.dynamic_rotate %122 by %c383_i32_84 dim 1 : vector<8x384xf32>, i32 -> vector<8x384xf32>
    %c363_i32_85 = arith.constant 363 : i32
    %128 = tpu.dynamic_rotate %122 by %c363_i32_85 dim 1 : vector<8x384xf32>, i32 -> vector<8x384xf32>
    %c362_i32_86 = arith.constant 362 : i32
    %129 = tpu.dynamic_rotate %122 by %c362_i32_86 dim 1 : vector<8x384xf32>, i32 -> vector<8x384xf32>
    %c361_i32_87 = arith.constant 361 : i32
    %130 = tpu.dynamic_rotate %122 by %c361_i32_87 dim 1 : vector<8x384xf32>, i32 -> vector<8x384xf32>
    %131 = tpu.concatenate %123, %124, %125, %126, %122, %127, %128, %129, %130 in 0 : vector<8x384xf32>, vector<8x384xf32>, vector<8x384xf32>, vector<8x384xf32>, vector<8x384xf32>, vector<8x384xf32>, vector<8x384xf32>, vector<8x384xf32>, vector<8x384xf32> -> vector<72x384xf32>
    %c0_88 = arith.constant 0 : index
    %c0_89 = arith.constant 0 : index
    %132 = vector.load %arg7[%c0_88, %c0_89] : memref<8x72xf32, #tpu.memory_space<vmem>>, vector<8x72xf32>
    %cst_90 = arith.constant dense<0.000000e+00> : vector<8x384xf32>
    %133 = tpu.matmul %132, %131, %cst_90 {dimension_numbers = #tpu.dot_dimension_numbers<[1], [0], [0], [1], [0, 0, 1, 1], [], []>} : vector<8x72xf32>, vector<72x384xf32>, vector<8x384xf32> -> vector<8x384xf32>
    %c0_91 = arith.constant 0 : index
    %c0_92 = arith.constant 0 : index
    %134 = vector.load %arg8[%c0_91, %c0_92] : memref<8x1xf32, #tpu.memory_space<vmem>>, vector<8x1xf32>
    %135 = vector.broadcast %134 : vector<8x1xf32> to vector<8x384xf32>
    %136 = arith.addf %133, %135 : vector<8x384xf32>
    %137 = arith.mulf %136, %2 : vector<8x384xf32>
    %138 = arith.addf %137, %105 : vector<8x384xf32>
    %cst_93 = arith.constant 0.000000e+00 : f32
    %139 = vector.broadcast %cst_93 : f32 to vector<8x384xf32>
    %140 = arith.maximumf %138, %139 : vector<8x384xf32>
    %c23_i32_94 = arith.constant 23 : i32
    %141 = tpu.dynamic_rotate %140 by %c23_i32_94 dim 1 : vector<8x384xf32>, i32 -> vector<8x384xf32>
    %c22_i32_95 = arith.constant 22 : i32
    %142 = tpu.dynamic_rotate %140 by %c22_i32_95 dim 1 : vector<8x384xf32>, i32 -> vector<8x384xf32>
    %c21_i32_96 = arith.constant 21 : i32
    %143 = tpu.dynamic_rotate %140 by %c21_i32_96 dim 1 : vector<8x384xf32>, i32 -> vector<8x384xf32>
    %c1_i32_97 = arith.constant 1 : i32
    %144 = tpu.dynamic_rotate %140 by %c1_i32_97 dim 1 : vector<8x384xf32>, i32 -> vector<8x384xf32>
    %c383_i32_98 = arith.constant 383 : i32
    %145 = tpu.dynamic_rotate %140 by %c383_i32_98 dim 1 : vector<8x384xf32>, i32 -> vector<8x384xf32>
    %c363_i32_99 = arith.constant 363 : i32
    %146 = tpu.dynamic_rotate %140 by %c363_i32_99 dim 1 : vector<8x384xf32>, i32 -> vector<8x384xf32>
    %c362_i32_100 = arith.constant 362 : i32
    %147 = tpu.dynamic_rotate %140 by %c362_i32_100 dim 1 : vector<8x384xf32>, i32 -> vector<8x384xf32>
    %c361_i32_101 = arith.constant 361 : i32
    %148 = tpu.dynamic_rotate %140 by %c361_i32_101 dim 1 : vector<8x384xf32>, i32 -> vector<8x384xf32>
    %149 = tpu.concatenate %141, %142, %143, %144, %140, %145, %146, %147, %148 in 0 : vector<8x384xf32>, vector<8x384xf32>, vector<8x384xf32>, vector<8x384xf32>, vector<8x384xf32>, vector<8x384xf32>, vector<8x384xf32>, vector<8x384xf32>, vector<8x384xf32> -> vector<72x384xf32>
    %c0_102 = arith.constant 0 : index
    %c0_103 = arith.constant 0 : index
    %150 = vector.load %arg9[%c0_102, %c0_103] : memref<8x72xf32, #tpu.memory_space<vmem>>, vector<8x72xf32>
    %cst_104 = arith.constant dense<0.000000e+00> : vector<8x384xf32>
    %151 = tpu.matmul %150, %149, %cst_104 {dimension_numbers = #tpu.dot_dimension_numbers<[1], [0], [0], [1], [0, 0, 1, 1], [], []>} : vector<8x72xf32>, vector<72x384xf32>, vector<8x384xf32> -> vector<8x384xf32>
    %c0_105 = arith.constant 0 : index
    %c0_106 = arith.constant 0 : index
    %152 = vector.load %arg10[%c0_105, %c0_106] : memref<8x1xf32, #tpu.memory_space<vmem>>, vector<8x1xf32>
    %153 = vector.broadcast %152 : vector<8x1xf32> to vector<8x384xf32>
    %154 = arith.addf %151, %153 : vector<8x384xf32>
    %155 = arith.mulf %154, %2 : vector<8x384xf32>
    %cst_107 = arith.constant 0.000000e+00 : f32
    %156 = vector.broadcast %cst_107 : f32 to vector<8x384xf32>
    %157 = arith.maximumf %155, %156 : vector<8x384xf32>
    %c23_i32_108 = arith.constant 23 : i32
    %158 = tpu.dynamic_rotate %157 by %c23_i32_108 dim 1 : vector<8x384xf32>, i32 -> vector<8x384xf32>
    %c22_i32_109 = arith.constant 22 : i32
    %159 = tpu.dynamic_rotate %157 by %c22_i32_109 dim 1 : vector<8x384xf32>, i32 -> vector<8x384xf32>
    %c21_i32_110 = arith.constant 21 : i32
    %160 = tpu.dynamic_rotate %157 by %c21_i32_110 dim 1 : vector<8x384xf32>, i32 -> vector<8x384xf32>
    %c1_i32_111 = arith.constant 1 : i32
    %161 = tpu.dynamic_rotate %157 by %c1_i32_111 dim 1 : vector<8x384xf32>, i32 -> vector<8x384xf32>
    %c383_i32_112 = arith.constant 383 : i32
    %162 = tpu.dynamic_rotate %157 by %c383_i32_112 dim 1 : vector<8x384xf32>, i32 -> vector<8x384xf32>
    %c363_i32_113 = arith.constant 363 : i32
    %163 = tpu.dynamic_rotate %157 by %c363_i32_113 dim 1 : vector<8x384xf32>, i32 -> vector<8x384xf32>
    %c362_i32_114 = arith.constant 362 : i32
    %164 = tpu.dynamic_rotate %157 by %c362_i32_114 dim 1 : vector<8x384xf32>, i32 -> vector<8x384xf32>
    %c361_i32_115 = arith.constant 361 : i32
    %165 = tpu.dynamic_rotate %157 by %c361_i32_115 dim 1 : vector<8x384xf32>, i32 -> vector<8x384xf32>
    %166 = tpu.concatenate %158, %159, %160, %161, %157, %162, %163, %164, %165 in 0 : vector<8x384xf32>, vector<8x384xf32>, vector<8x384xf32>, vector<8x384xf32>, vector<8x384xf32>, vector<8x384xf32>, vector<8x384xf32>, vector<8x384xf32>, vector<8x384xf32> -> vector<72x384xf32>
    %c0_116 = arith.constant 0 : index
    %c0_117 = arith.constant 0 : index
    %167 = vector.load %arg11[%c0_116, %c0_117] : memref<8x72xf32, #tpu.memory_space<vmem>>, vector<8x72xf32>
    %cst_118 = arith.constant dense<0.000000e+00> : vector<8x384xf32>
    %168 = tpu.matmul %167, %166, %cst_118 {dimension_numbers = #tpu.dot_dimension_numbers<[1], [0], [0], [1], [0, 0, 1, 1], [], []>} : vector<8x72xf32>, vector<72x384xf32>, vector<8x384xf32> -> vector<8x384xf32>
    %c0_119 = arith.constant 0 : index
    %c0_120 = arith.constant 0 : index
    %169 = vector.load %arg12[%c0_119, %c0_120] : memref<8x1xf32, #tpu.memory_space<vmem>>, vector<8x1xf32>
    %170 = vector.broadcast %169 : vector<8x1xf32> to vector<8x384xf32>
    %171 = arith.addf %168, %170 : vector<8x384xf32>
    %172 = arith.mulf %171, %2 : vector<8x384xf32>
    %173 = arith.addf %172, %140 : vector<8x384xf32>
    %cst_121 = arith.constant 0.000000e+00 : f32
    %174 = vector.broadcast %cst_121 : f32 to vector<8x384xf32>
    %175 = arith.maximumf %173, %174 : vector<8x384xf32>
    %c1 = arith.constant 1 : index
    %c0_122 = arith.constant 0 : index
    %c0_123 = arith.constant 0 : index
    %176 = vector.load %arg13[%c1, %c0_122, %c0_123] : memref<2x8x384xf32, #tpu.memory_space<vmem>>, vector<1x8x384xf32>
    %177 = vector.shape_cast %176 : vector<1x8x384xf32> to vector<8x384xf32>
    %178 = vector.shape_cast %175 : vector<8x384xf32> to vector<1x8x384xf32>
    tpu.vector_store %arg13[%c1, %c0_122, %c0_123], %178 {strides = array<i32>} : memref<2x8x384xf32, #tpu.memory_space<vmem>>, vector<1x8x384xf32>,
    return
  }
  func.func @transform_0(%arg0: i32) -> (i32, i32, i32) {
    %c0_i32 = arith.constant 0 : i32
    %c0_i32_0 = arith.constant 0 : i32
    %c0_i32_1 = arith.constant 0 : i32
    return %arg0, %c0_i32, %c0_i32_0 : i32, i32, i32
  }
  func.func @transform_1(%arg0: i32) -> (i32, i32, i32) {
    %c0_i32 = arith.constant 0 : i32
    %c0_i32_0 = arith.constant 0 : i32
    %c0_i32_1 = arith.constant 0 : i32
    %c0_i32_2 = arith.constant 0 : i32
    return %c0_i32, %c0_i32_0, %c0_i32_1 : i32, i32, i32
  }
  func.func @transform_2(%arg0: i32) -> (i32, i32, i32) {
    %c0_i32 = arith.constant 0 : i32
    %c0_i32_0 = arith.constant 0 : i32
    %c0_i32_1 = arith.constant 0 : i32
    %c0_i32_2 = arith.constant 0 : i32
    return %c0_i32, %c0_i32_0, %c0_i32_1 : i32, i32, i32
  }
  func.func @transform_3(%arg0: i32) -> (i32, i32, i32) {
    %c0_i32 = arith.constant 0 : i32
    %c0_i32_0 = arith.constant 0 : i32
    %c0_i32_1 = arith.constant 0 : i32
    %c0_i32_2 = arith.constant 0 : i32
    return %c0_i32, %c0_i32_0, %c0_i32_1 : i32, i32, i32
  }
  func.func @transform_4(%arg0: i32) -> (i32, i32) {
    %c0_i32 = arith.constant 0 : i32
    %c0_i32_0 = arith.constant 0 : i32
    %c0_i32_1 = arith.constant 0 : i32
    return %c0_i32, %c0_i32_0 : i32, i32
  }
  func.func @transform_5(%arg0: i32) -> (i32, i32) {
    %c0_i32 = arith.constant 0 : i32
    %c0_i32_0 = arith.constant 0 : i32
    %c0_i32_1 = arith.constant 0 : i32
    return %c0_i32, %c0_i32_0 : i32, i32
  }
  func.func @transform_6(%arg0: i32) -> (i32, i32) {
    %c0_i32 = arith.constant 0 : i32
    %c0_i32_0 = arith.constant 0 : i32
    %c0_i32_1 = arith.constant 0 : i32
    return %c0_i32, %c0_i32_0 : i32, i32
  }
  func.func @transform_7(%arg0: i32) -> (i32, i32) {
    %c0_i32 = arith.constant 0 : i32
    %c0_i32_0 = arith.constant 0 : i32
    %c0_i32_1 = arith.constant 0 : i32
    return %c0_i32, %c0_i32_0 : i32, i32
  }
  func.func @transform_8(%arg0: i32) -> (i32, i32) {
    %c0_i32 = arith.constant 0 : i32
    %c0_i32_0 = arith.constant 0 : i32
    %c0_i32_1 = arith.constant 0 : i32
    return %c0_i32, %c0_i32_0 : i32, i32
  }
  func.func @transform_9(%arg0: i32) -> (i32, i32) {
    %c0_i32 = arith.constant 0 : i32
    %c0_i32_0 = arith.constant 0 : i32
    %c0_i32_1 = arith.constant 0 : i32
    return %c0_i32, %c0_i32_0 : i32, i32
  }
  func.func @transform_10(%arg0: i32) -> (i32, i32) {
    %c0_i32 = arith.constant 0 : i32
    %c0_i32_0 = arith.constant 0 : i32
    %c0_i32_1 = arith.constant 0 : i32
    return %c0_i32, %c0_i32_0 : i32, i32
  }
  func.func @transform_11(%arg0: i32) -> (i32, i32) {
    %c0_i32 = arith.constant 0 : i32
    %c0_i32_0 = arith.constant 0 : i32
    %c0_i32_1 = arith.constant 0 : i32
    return %c0_i32, %c0_i32_0 : i32, i32
  }
  func.func @transform_12(%arg0: i32) -> (i32, i32, i32) {
    %c0_i32 = arith.constant 0 : i32
    %c0_i32_0 = arith.constant 0 : i32
    %c0_i32_1 = arith.constant 0 : i32
    return %arg0, %c0_i32, %c0_i32_0 : i32, i32, i32
  }
}

</mosaic_0001>

<bundles_post_ra>
// kernel: tpu_custom_call.1
= control target key start
LH: loop header
LB: loop body
LE: loop exit
PB: predicated region body
PF: predicated region fallthrough
CT: control target
= control target key end

     0   :  { %s3843_s0 = inlined_call_operand.hbm [shape: f32[4,8,384], index: 0, kind: input, shape index: {}]   ;;  %s3844_s1 = inlined_call_operand.hbm [shape: f32[1,8,384], index: 1, kind: input, shape index: {}]   ;;  %s3845_s2 = inlined_call_operand.hbm [shape: f32[1,1,384], index: 2, kind: input, shape index: {}]   ;;  %s3846_s3 = inlined_call_operand.hbm [shape: f32[1,1,384], index: 3, kind: input, shape index: {}]   ;;  %s3847_s4 = inlined_call_operand.vmem [shape: f32[8,72], index: 4, kind: input, shape index: {}]   ;;  %s3848_s5 = inlined_call_operand.vmem [shape: f32[8,1], index: 5, kind: input, shape index: {}]   ;;  %s3849_s6 = inlined_call_operand.vmem [shape: f32[8,72], index: 6, kind: input, shape index: {}]   ;;  %s3850_s7 = inlined_call_operand.vmem [shape: f32[8,1], index: 7, kind: input, shape index: {}]   ;;  %s3851_s8 = inlined_call_operand.vmem [shape: f32[8,72], index: 8, kind: input, shape index: {}]   ;;  %s3852_s9 = inlined_call_operand.vmem [shape: f32[8,1], index: 9, kind: input, shape index: {}]   ;;  %s3853_s10 = inlined_call_operand.vmem [shape: f32[8,72], index: 10, kind: input, shape index: {}]   ;;  %s3854_s11 = inlined_call_operand.vmem [shape: f32[8,1], index: 11, kind: input, shape index: {}]   ;;  %s3855_s12 = inlined_call_operand.hbm [shape: f32[4,8,384], index: 12, kind: output, shape index: {}]  }
   0x1   :  { %3861 = sst [smem:[#allocation20_spill]] %s3844_s1 }
   0x2   :  { %3862 = sst [smem:[#allocation21_spill]] %s3845_s2 }
   0x3   :  { %3863 = sst [smem:[#allocation22_spill]] %s3846_s3 }
   0x4   :  { %17 = vsyncpa [#allocation3], 0 }
   0x5   :  { %19 = vsyncpa [#allocation3 + $0x1], 0 }
   0x6   :  { %20 = vsyncpa [#allocation6], 0 }
   0x7   :  { %21 = vsyncpa [#allocation9], 0 }
   0x8   :  { %22 = vsyncpa [#allocation4], 0 }
   0x9   :  { %24 = vsyncpa [#allocation4 + $0x1], 0  ;;  %s2707_s21 = smov 0   ;;  %s2709_s22 = smov 0  }
   0xa   :  { %s2711_s23 = smov 0   ;;  %s2713_s24 = smov 0  }
   0xb LB: > { %3864 = sst [smem:[#allocation15_spill]] %s2620_s23  ;;  %s2728_s25 = sadd.s32 4294967295, %s2624_s24   ;;  %s2624_s24 = sphi %s2713_s24, %s3880_s24   ;;  %s2620_s23 = sphi %s2711_s23, %s3882_s23   ;;  %s2616_s22 = sphi %s2709_s22, %s3884_s22   ;;  %s2612_s21 = sphi %s2707_s21, %s3883_s21  }
   0xc   : > { %3865 = sst [smem:[#allocation16_spill]] %s2624_s24  ;;  %s1921_s26 = sadd.s32 4294967294, %s2624_s24  }
   0xd   : > { %p50_p0 = scmp.ne.s32.totalorder %s2616_s22, %s2612_s21  ;;  %p51_p1 = scmp.eq.s32.totalorder %s2728_s25, 0 }
   0xe   : > { %p305_p2 = scmp.eq.s32.totalorder %s2728_s25, 1  ;;  %p311_p3 = scmp.eq.s32.totalorder %s1921_s26, 1 }
   0xf   : > { %p2737_p4 = por %p51_p1, %p50_p0  ;;  %p1922_p5 = scmp.ge.s32.totalorder %s2624_s24, 1 }
  0x10   : > { %p2742_p6 = por %p311_p3, %p50_p0  ;;  %p318_p7 = scmp.lt.s32.totalorder %s2624_s24, 3 }
  0x11   : > { %s3869_s1 = sld [smem:[#allocation20_spill]]  ;;  %s2626_s15 = smov [#allocation5]  }
  0x12   : > { %s3867_s28 = scalar_select %p2742_p6, 1, 0 }
  0x13   : > { %p2750_p8 = pnand %p1922_p5, %p318_p7  ;;  %s332_s16 = sshll.u32 %s2626_s15, 4  ;;  %s333_s16 = int_to_ptr.vmem [resolvable:$true] %s332_s16 }
  0x14   : > { %3868 = sst [smem:[#allocation17_spill]] %s3867_s28  ;;  %s2627_s30 = smov [#allocation7]  }
  0x15   : > { %p1986_p10 = pneg %p2750_p8  ;;  %s3871_s2 = sld [smem:[#allocation21_spill]] }
  0x16   : > { %s3872_s3 = sld [smem:[#allocation22_spill]]  ;;  %s344_s15 = sshll.u32 %s2627_s30, 4  ;;  %s345_s15 = int_to_ptr.vmem [resolvable:$true] %s344_s15 }
  0x17   : > { %s330_s13 = sshll.u32 %s3869_s1, 4  ;;  %p1987_p11 = pnand %p1986_p10, %p51_p1  ;;  %s331_s13 = int_to_ptr.hbm [resolvable:$true] %s330_s13 }
  0x18   : > { %s2628_s17 = smov [#allocation8]   ;;  %s2766_s1 = sadd.s32 1, %s2624_s24  }
  0x19   : > { %1989 = dma.hbm_to_vmem [thread:$0]  (!%p1987_p11), %s331_s13, 384, %s333_s16, [#allocation6]  }
  0x1a   : > { %s356_s18 = sshll.u32 %s2628_s17, 4  ;;  %3873 = sst [smem:[#allocation18_spill]] %s2766_s1  ;;  %s357_s18 = int_to_ptr.vmem [resolvable:$true] %s356_s18 }
  0x1b   : > { %s342_s19 = sshll.u32 %s3871_s2, 4  ;;  %s34_s20 = ssub.s32 %s2624_s24, %s2766_s1  ;;  %s343_s19 = int_to_ptr.hbm [resolvable:$true] %s342_s19 }
  0x1c   : > { %s354_s29 = sshll.u32 %s3872_s3, 4  ;;  %s37_s26 = sadd.s32 1, %s2620_s23  ;;  %s355_s29 = int_to_ptr.hbm [resolvable:$true] %s354_s29 }
  0x1d   : > { %1992 = dma.hbm_to_vmem [thread:$0]  (!%p1987_p11), %s343_s19, 48, %s345_s15, [#allocation6]  }
  0x1e   : > { %1995 = dma.hbm_to_vmem [thread:$0]  (!%p1987_p11), %s355_s29, 48, %s357_s18, [#allocation9]  }
  0x1f   : > { %p35_p12 = scmp.eq.s32.totalorder %s34_s20, 0  ;;  %p44_p13 = scmp.ne.s32.totalorder %s2620_s23, %s2616_s22 }
  0x20   : > { %p45_p0 = scmp.eq.s32.totalorder %s2624_s24, 0  ;;  %p2007_p3 = scmp.lt.s32.totalorder %s2624_s24, 2 }
  0x21   : > { %s2776_s13 = scalar_select %p35_p12, %s2620_s23, %s37_s26  }
  0x22   : > { %p46_p5 = por %p45_p0, %p44_p13  ;;  %p2780_p7 = por %p305_p2, %p44_p13 }
  0x23   : > { %3874 = sst [smem:[#allocation19_spill]] %s2776_s13  ;;  %s391_s19 = sand.u32 1, %s2620_s23  }
  0x24   : > { %s1967_s30 = smul.u32 48, %s2624_s24  ;;  %p2789_p10 = pnand %p2007_p3, %p46_p5 }
  0x25   : > { %s1966_s15 = smul.u32 48, %s391_s19  ;;  %s392_s13 = scalar_lea.sflag [#allocation3], %s391_s19 }
  0x26   : > { %s401_s29 = scalar_lea.hbm %s3843_s0, %s1967_s30  ;;  %p2524_p11 = pneg %p2789_p10 }
  0x27   : > { %s402_s20 = sshll.u32 %s401_s29, 4  ;;  %s395_s26 = scalar_lea.vmem [#allocation2], %s1966_s15  ;;  %s403_s20 = int_to_ptr.hbm [resolvable:$true] %s402_s20 }
  0x28   : > { %s404_s3 = sshll.u32 %s395_s26, 4  ;;  %s2520_s1 = sshra.s32 %s403_s20, 4  ;;  %s405_s3 = int_to_ptr.vmem [resolvable:$true] %s404_s3  ;;  %s2521_s1 = int_to_ptr.hbm [resolvable:$true] %s2520_s1 }
  0x29   : > { %s2522_s23 = scalar_lea.hbm %s2521_s1, 48  ;;  %s2527_s17 = scalar_lea.hbm %s3843_s0, 96 }
  0x2a   : > { %p2523_p2 = scmp.ne.s32.totalorder %s2521_s1, %s2522_s23  ;;  %p2528_p0 = scmp.lt.s32.totalorder %s2521_s1, %s3843_s0 }
  0x2b   : > { %p2529_p3 = scmp.lt.s32.totalorder %s2527_s17, %s2522_s23 }
  0x2c   : > { %p2525_p12 = pnand %p2524_p11, %p2523_p2 }
  0x2d   : > { %p2530_p5 = por %p2529_p3, %p2528_p0 }
  0x2e   : > { %p2526_p13 = pneg %p2525_p12 }
  0x30   : > { %p2531_p9 = pnand %p2530_p5, %p2526_p13 }
  0x32   : > { %2534 = shalt.err (!%p2531_p9)
}
  0x33   : > { %s2629_s19 = smov 384   ;;  %s2630_s15 = smov 24  }
  0x34   : > { %1999 = dma.hbm_to_vmem [thread:$0]  (!%p2789_p10), %s403_s20, 768, %s405_s3, %s392_s13, %s2629_s19, %s2629_s19, %s2630_s15  }
  0x35   : > { %416 = sbr.rel (%p2750_p8) target bundleno = 2307 (0x903), region = 68  ;;  %s2806_s29 = sand.u32 (!%p2750_p8), 1, %s2616_s22  }
  0x36   : > { %s1968_s1 = smul.u32 (!%p2750_p8), 48, %s2806_s29  ;;  %s419_s23 = scalar_lea.sflag (!%p2750_p8), [#allocation3], %s2806_s29 }
  0x38   : > { %s2812_s24 = scalar_lea.vmem (!%p2750_p8), [#allocation2], %s1968_s1 }
  0x3a   : > { %2595 = dma.done.wait (%p2737_p4), %s419_s23, 768  }
  0x3b   : > { %2597 = vsyncadd (%p2737_p4), %s419_s23, 4294966528 }
  0x3c   : > { %2599 = dma.done.wait (%p51_p1), [#allocation6], 432  }
  0x3d   : > { %2601 = vsyncadd (%p51_p1), [#allocation6], 4294966864 }
  0x3e   : > { %2603 = dma.done.wait (%p51_p1), [#allocation9], 48  }
  0x3f   : > { %2605 = vsyncadd (%p51_p1), [#allocation9], 4294967248  ;;  %v481_v0 = vld [vmem:[%s2812_s24] sm:$0xff]  ;;  %v482_v1 = vld [vmem:[%s2812_s24 + $0x8] sm:$0xff]  ;;  %s2631_s3 = smov 107   ;;  %s2632_s27 = smov 106   ;;  %v594_v53 = vlaneseq }
  0x40   : > { %v483_v2 = vld [vmem:[%s2812_s24 + $0x10] sm:$0xff]  ;;  %v490_v3 = vadd.f32 %v482_v1, %v481_v0  ;;  %v500_v4 = vmul.f32 %v481_v0, %v481_v0  ;;  %v501_v5 = vmul.f32 %v482_v1, %v482_v1  ;;  %v2829_v21 = vld [vmem:[#allocation7] sm:$0x7]  ;;  %v2831_v23 = vld [vmem:[#allocation8] sm:$0x7]  ;;  %s2633_s28 = smov 105  }
  0x41   : > { %v502_v7 = vmul.f32 %v483_v2, %v483_v2  ;;  %v556_v27 = vperm.slane %v2829_v21, 0  ;;  %v557_v28 = vperm.slane %v2829_v21, 1  ;;  %v570_v30 = vperm.slane %v2831_v23, 0  ;;  %v2841_v37 = vld [vmem:[#allocation5] sm:$0xff]  ;;  %v2843_v38 = vld [vmem:[#allocation5 + $0x8] sm:$0xff]  ;;  %v2866_v49 = vld [vmem:[#allocation5 + $0x10] sm:$0xff] }
  0x42   : > { %v491_v6 = vadd.f32 %v490_v3, %v483_v2  ;;  %v506_v8 = vadd.f32 %v501_v5, %v500_v4  ;;  %v571_v31 = vperm.slane %v2831_v23, 1  ;;  %v558_v39 = vperm.slane %v2829_v21, 2  ;;  %s2634_s14 = smov 21   ;;  %s2635_s13 = smov 23  }
  0x43   : > { %v572_v45 = vperm.slane %v2831_v23, 2  ;;  %s2636_s18 = smov 127   ;;  %s2637_s20 = smov 1   ;;  %v2892_v54 = vand.u32 127, %v594_v53  ;;  %vm677_vm11 = vcmask 588800  }
  0x44   : > { %492 = vadd.xlane.f32.xlu0 %v491_v6  ;;  %v507_v9 = vadd.f32 %v506_v8, %v502_v7  ;;  %s2638_s26 = smov 22   ;;  %s2570_s30 = scalar_lea.hbm %s3855_s12, 96 }
  0x45   : > { %vm666_vm3 = vcmp.lt.s32.totalorder %v2892_v54, 105  ;;  %vm656_vm4 = vcmp.lt.s32.totalorder %v2892_v54, 106  ;;  %vm646_vm5 = vcmp.lt.s32.totalorder %v2892_v54, 107  ;;  %vm636_vm6 = vcmp.lt.s32.totalorder %v2892_v54, 127 }
  0x46   : > { %vm626_vm7 = vcmp.lt.s32.totalorder %v2892_v54, 1  ;;  %vm616_vm8 = vcmp.lt.s32.totalorder %v2892_v54, 21  ;;  %vm606_vm9 = vcmp.lt.s32.totalorder %v2892_v54, 22  ;;  %vm596_vm10 = vcmp.lt.s32.totalorder %v2892_v54, 23 }
  0x4c   : > { %508 = vadd.xlane.f32.xlu0 %v507_v9 }
  0xb7   : > { %v493_v10 = vpop.xlane.xlu0 %492 }
  0xb8   : > { %v498_v11 = vmul.f32 0.005, %v493_v10 }
  0xba   : > { %v516_v13 = vmul.f32 %v498_v11, %v498_v11  ;;  %v520_v25 = vsub.f32 %v481_v0, %v498_v11  ;;  %v521_v26 = vsub.f32 %v482_v1, %v498_v11  ;;  %v522_v34 = vsub.f32 %v483_v2, %v498_v11 }
  0xbf   : > { %v509_v12 = vpop.xlane.xlu0 %508 }
  0xc0   : > { %v514_v14 = vmul.f32 0.005, %v509_v12 }
  0xc2   : > { %v518_v15 = vsub.f32 %v514_v14, %v516_v13 }
  0xc4   : > { %v526_v16 = vadd.f32 1e-05, %v518_v15  ;;  %v2922_v15 = vld [vmem:[%s3848_s5] sm:$0xff] }
  0xc6   : > { %2423 = vrsqrt.f32 %v526_v16  ;;  %vm534_vm1 = vweird.f32 %v526_v16 }
  0xcc   : > { %v2424_v17 = vpop.eup %2423 }
  0xcd   : > { %v529_v18 = vmul.f32 %v2424_v17, %v526_v16  ;;  %vm535_vm0 = vweird.f32 %v2424_v17  ;;  %v2639_v16 = vmov 0  }
  0xce   : > { %vm536_vm2 = vmor %vm534_vm1, %vm535_vm0  ;;  %2100 = vset.pattern.permute.xlu2 %v2639_v16  ;;  %2141 = vset.pattern.permute.xlu1 %v2639_v16 }
  0xcf   : > { %v530_v19 = vmul.f32 %v2424_v17, %v529_v18  ;;  %2342 = vset.pattern.permute.xlu0 %v2639_v16 }
  0xd1   : > { %v531_v20 = vmul.f32 0.5, %v530_v19 }
  0xd3   : > { %v532_v22 = vsub.f32 1.5, %v531_v20 }
  0xd5   : > { %v533_v24 = vmul.f32 %v2424_v17, %v532_v22 }
  0xd7   : > { %v537_v29 = vsel %vm536_vm2, %v2424_v17, %v533_v24 }
  0xd8   : > { %v548_v32 = vmul.f32 %v537_v29, %v520_v25  ;;  %v549_v33 = vmul.f32 %v537_v29, %v521_v26  ;;  %v550_v40 = vmul.f32 %v537_v29, %v522_v34 }
  0xda   : > { %v562_v35 = vmul.f32 %v556_v27, %v548_v32  ;;  %v563_v36 = vmul.f32 %v557_v28, %v549_v33  ;;  %v564_v46 = vmul.f32 %v558_v39, %v550_v40 }
  0xdc   : > { %v576_v41 = vadd.f32 %v570_v30, %v562_v35  ;;  %v577_v42 = vadd.f32 %v571_v31, %v563_v36  ;;  %v578_v48 = vadd.f32 %v572_v45, %v564_v46 }
  0xde   : > { %v2851_v43 = vmul.f32 %v576_v41, %v2841_v37  ;;  %v2854_v44 = vmul.f32 %v577_v42, %v2843_v38  ;;  %v2869_v50 = vmul.f32 %v578_v48, %v2866_v49 }
  0xe0   : > { %v2070_v47 = vpack.i.bf16 %v2854_v44, %v2851_v43 }
  0xe2   : > { %2071 = vrot.lane.b32.xlu0 %v2070_v47, %s2631_s3  ;;  %2066 = vrot.lane.b32.xlu2 %v2070_v47, %s2632_s27 }
  0xe3   : > { %2061 = vrot.lane.b32.xlu1 %v2070_v47, %s2633_s28 }
  0xea   : > { %614 = vrot.lane.b32.xlu0 %v2869_v50, %s2634_s14  ;;  %654 = vrot.lane.b32.xlu2 %v2869_v50, %s2632_s27 }
  0xeb   : > { %664 = vrot.lane.b32.xlu1 %v2869_v50, %s2633_s28 }
  0xf2   : > { %2096 = vrot.lane.b32.xlu0 %v2070_v47, %s2635_s13  ;;  %2076 = vrot.lane.b32.xlu2 %v2070_v47, %s2636_s18 }
  0xf3   : > { %644 = vrot.lane.b32.xlu1 %v2869_v50, %s2631_s3 }
  0xfa   : > { %2081 = vrot.lane.b32.xlu2 %v2070_v47, %s2637_s20 }
  0xfb   : > { %634 = vrot.lane.b32.xlu1 %v2869_v50, %s2636_s18 }
 0x102   : > { %2086 = vrot.lane.b32.xlu2 %v2070_v47, %s2634_s14 }
 0x103   : > { %624 = vrot.lane.b32.xlu1 %v2869_v50, %s2637_s20 }
 0x10a   : > { %604 = vrot.lane.b32.xlu2 %v2869_v50, %s2638_s26 }
 0x10b   : > { %2091 = vrot.lane.b32.xlu1 %v2070_v47, %s2638_s26 }
 0x112   : > { %674 = vperm.xlu2 %2100, %v2922_v15  }
 0x113   : > { %592 = vrot.lane.b32.xlu1 %v2869_v50, %s2635_s13 }
 0x13c   : > { %v2067_v51 = vpop.permute.xlu2 %2066 }
 0x13d   : > { %v2069_v57 = vunpack.i.h.bf16 %v2067_v51  ;;  %v2068_v58 = vunpack.i.l.bf16 %v2067_v51 }
 0x13f   : > { %v658_v3 = vsel %vm656_vm4, %v2068_v58, %v2069_v57 }
 0x144   : > { %v655_v52 = vpop.permute.xlu2 %654 }
 0x145   : > { %v657_v9 = vsel %vm656_vm4, %v2069_v57, %v655_v52  ;;  %v659_v10 = vsel %vm656_vm4, %v655_v52, %v2068_v58  ;;  %v670_v58 = vld [vmem:[%s3847_s4] sm:$0xff] }
 0x14c   : > { %v2077_v61 = vpop.permute.xlu2 %2076 }
 0x14d   : > { %v2079_v1 = vunpack.i.h.bf16 %v2077_v61  ;;  %v2078_v2 = vunpack.i.l.bf16 %v2077_v61 }
 0x14f   : > { %v638_v6 = vsel %vm636_vm6, %v2078_v2, %v2079_v1 }
 0x154   : > { %v2072_v55 = vpop.permute.xlu0 %2071  ;;  %v2082_v11 = vpop.permute.xlu2 %2081 }
 0x155   : > { %v2062_v56 = vpop.permute.xlu1 %2061  ;;  %v2074_v62 = vunpack.i.h.bf16 %v2072_v55  ;;  %v2073_v63 = vunpack.i.l.bf16 %v2072_v55  ;;  %v2084_v19 = vunpack.i.h.bf16 %v2082_v11  ;;  %v2083_v20 = vunpack.i.l.bf16 %v2082_v11 }
 0x156   : > { %v2064_v59 = vunpack.i.h.bf16 %v2062_v56  ;;  %v2063_v60 = vunpack.i.l.bf16 %v2062_v56 }
 0x157   : > { %v648_v4 = vsel %vm646_vm5, %v2073_v63, %v2074_v62  ;;  %v628_v32 = vsel %vm626_vm7, %v2083_v20, %v2084_v19 }
 0x158   : > { %v668_v0 = vsel %vm666_vm3, %v2063_v60, %v2064_v59 }
 0x159   : > { %688 = vmatpush.msra.mxu0 %v668_v0 }
 0x15b   : > { %689 = vmatpush.msra.mxu0 %v658_v3 }
 0x15c   : > { %v2087_v17 = vpop.permute.xlu2 %2086  ;;  %v615_v29 = vpop.permute.xlu0 %614 }
 0x15d   : > { %v665_v5 = vpop.permute.xlu1 %664  ;;  %690 = vmatpush.msra.mxu0 %v648_v4  ;;  %v2089_v25 = vunpack.i.h.bf16 %v2087_v17  ;;  %v2088_v26 = vunpack.i.l.bf16 %v2087_v17 }
 0x15e   : > { %v667_v7 = vsel %vm666_vm3, %v2064_v59, %v665_v5  ;;  %v669_v8 = vsel %vm666_vm3, %v665_v5, %v2063_v60 }
 0x15f   : > { %691 = vmatpush.msra.mxu0 %v638_v6  ;;  %708 = vmatpush.msra.mxu1 %v667_v7  ;;  %v618_v33 = vsel %vm616_vm8, %v2088_v26, %v2089_v25  ;;  %v619_v40 = vsel %vm616_vm8, %v615_v29, %v2088_v26  ;;  %v617_v41 = vsel %vm616_vm8, %v2089_v25, %v615_v29 }
 0x160   : > { %728 = vmatpush.msra.mxu2 %v669_v8 }
 0x161   : > { %692 = vmatpush.msra.mxu0 %v2851_v43  ;;  %709 = vmatpush.msra.mxu1 %v657_v9 }
 0x162   : > { %729 = vmatpush.msra.mxu2 %v659_v10 }
 0x164   : > { %v2097_v42 = vpop.permute.xlu0 %2096  ;;  %v605_v53 = vpop.permute.xlu2 %604 }
 0x165   : > { %v645_v12 = vpop.permute.xlu1 %644  ;;  %v2099_v47 = vunpack.i.h.bf16 %v2097_v42  ;;  %v2098_v48 = vunpack.i.l.bf16 %v2097_v42 }
 0x166   : > { %v647_v13 = vsel %vm646_vm5, %v2074_v62, %v645_v12  ;;  %v649_v14 = vsel %vm646_vm5, %v645_v12, %v2073_v63 }
 0x167   : > { %710 = vmatpush.msra.mxu1 %v647_v13  ;;  %730 = vmatpush.msra.mxu2 %v649_v14  ;;  %v598_v59 = vsel %vm596_vm10, %v2098_v48, %v2099_v47 }
 0x16c   : > { %v675_v63 = vpop.permute.xlu2 %674 }
 0x16d   : > { %v635_v18 = vpop.permute.xlu1 %634 }
 0x16e   : > { %v637_v22 = vsel %vm636_vm6, %v2079_v1, %v635_v18  ;;  %v639_v24 = vsel %vm636_vm6, %v635_v18, %v2078_v2 }
 0x16f   : > { %711 = vmatpush.msra.mxu1 %v637_v22  ;;  %731 = vmatpush.msra.mxu2 %v639_v24 }
 0x171   : > { %712 = vmatpush.msra.mxu1 %v2854_v44  ;;  %732 = vmatpush.msra.mxu2 %v2869_v50 }
 0x173   : > { %713 = vmatpush.msra.mxu1 %v628_v32 }
 0x175   : > { %v625_v34 = vpop.permute.xlu1 %624  ;;  %714 = vmatpush.msra.mxu1 %v618_v33 }
 0x176   : > { %v629_v35 = vsel %vm626_vm7, %v625_v34, %v2083_v20  ;;  %v627_v36 = vsel %vm626_vm7, %v2084_v19, %v625_v34 }
 0x177   : > { %693 = vmatpush.msra.mxu0 %v629_v35  ;;  %733 = vmatpush.msra.mxu2 %v627_v36 }
 0x179   : > { %694 = vmatpush.msra.mxu0 %v619_v40  ;;  %734 = vmatpush.msra.mxu2 %v617_v41 }
 0x17d   : > { %v2092_v46 = vpop.permute.xlu1 %2091 }
 0x17e   : > { %v2094_v51 = vunpack.i.h.bf16 %v2092_v46  ;;  %v2093_v52 = vunpack.i.l.bf16 %v2092_v46 }
 0x180   : > { %v609_v55 = vsel %vm606_vm9, %v605_v53, %v2093_v52  ;;  %v608_v56 = vsel %vm606_vm9, %v2093_v52, %v2094_v51  ;;  %v607_v57 = vsel %vm606_vm9, %v2094_v51, %v605_v53  ;;  %v820_v52 = vld [vmem:[%s3850_s7] sm:$0xff] }
 0x181   : > { %695 = vmatpush.msra.mxu0 %v609_v55  ;;  %715 = vmatpush.msra.mxu1 %v608_v56 }
 0x182   : > { %735 = vmatpush.msra.mxu2 %v607_v57 }
 0x183   : > { %716 = vmatpush.msra.mxu1 %v598_v59 }
 0x184   : > { %1935 = vmatmul.msk.f32.vlgmr.msra.gmra.mxu1 %vm677_vm11, %v670_v58 }
 0x185   : > { %v593_v60 = vpop.permute.xlu1 %592 }
 0x186   : > { %v599_v61 = vsel %vm596_vm10, %v593_v60, %v2098_v48  ;;  %v597_v62 = vsel %vm596_vm10, %v2099_v47, %v593_v60 }
 0x187   : > { %696 = vmatpush.msra.mxu0 %v599_v61  ;;  %736 = vmatpush.msra.mxu2 %v597_v62 }
 0x188   : > { %1934 = vmatmul.msk.f32.vlgmr.msra.gmra.mxu0 %vm677_vm11, %v670_v58  ;;  %1936 = vmatmul.msk.f32.vlgmr.msra.gmra.mxu2 %vm677_vm11, %v670_v58 }
 0x201   : > { %v718_v0 = vpop.f32.mrf.mxu1 }
 0x202   : > { %v719_v1 = vadd.f32 %v718_v0, %v675_v63 }
 0x204   : > { %v742_v2 = vmul.f32 %v719_v1, %v2843_v38 }
 0x205   : > { %v698_v3 = vpop.f32.mrf.mxu0 }
 0x206   : > { %v699_v4 = vadd.f32 %v698_v3, %v675_v63  ;;  %v2967_v6 = vmax.f32 %v742_v2, 0.0 }
 0x208   : > { %v741_v5 = vmul.f32 %v699_v4, %v2841_v37 }
 0x20a   : > { %v744_v7 = vmax.f32 %v741_v5, 0.0 }
 0x20b   : > { %v738_v8 = vpop.f32.mrf.mxu2 }
 0x20c   : > { %v739_v9 = vadd.f32 %v738_v8, %v675_v63  ;;  %v2111_v10 = vpack.i.bf16 %v2967_v6, %v744_v7 }
 0x20e   : > { %2112 = vrot.lane.b32.xlu2 %v2111_v10, %s2631_s3  ;;  %2107 = vrot.lane.b32.xlu1 %v2111_v10, %s2632_s27  ;;  %v743_v11 = vmul.f32 %v739_v9, %v2866_v49 }
 0x20f   : > { %2102 = vrot.lane.b32.xlu0 %v2111_v10, %s2633_s28 }
 0x210   : > { %v2974_v12 = vmax.f32 %v743_v11, 0.0  ;;  %v819_v11 = vld [vmem:[%s3849_s6] sm:$0xff] }
 0x212   : > { %v2126_v13 = vpack.i.bf16 %v2974_v12, %v744_v7 }
 0x216   : > { %805 = vrot.lane.b32.xlu2 %v2974_v12, %s2632_s27  ;;  %814 = vrot.lane.b32.xlu1 %v2974_v12, %s2633_s28 }
 0x217   : > { %2117 = vrot.lane.b32.xlu0 %v2111_v10, %s2636_s18 }
 0x21e   : > { %2127 = vrot.lane.b32.xlu2 %v2126_v13, %s2634_s14  ;;  %796 = vrot.lane.b32.xlu1 %v2974_v12, %s2631_s3 }
 0x21f   : > { %2122 = vrot.lane.b32.xlu0 %v2126_v13, %s2637_s20 }
 0x226   : > { %2137 = vrot.lane.b32.xlu2 %v2126_v13, %s2635_s13  ;;  %2132 = vrot.lane.b32.xlu1 %v2126_v13, %s2638_s26 }
 0x227   : > { %787 = vrot.lane.b32.xlu0 %v2974_v12, %s2636_s18 }
 0x22e   : > { %758 = vrot.lane.b32.xlu2 %v2967_v6, %s2638_s26  ;;  %767 = vrot.lane.b32.xlu1 %v2967_v6, %s2634_s14 }
 0x22f   : > { %776 = vrot.lane.b32.xlu0 %v2967_v6, %s2637_s20 }
 0x236   : > { %823 = vperm.xlu1 %2141, %v820_v52  }
 0x237   : > { %749 = vrot.lane.b32.xlu0 %v2967_v6, %s2635_s13 }
 0x268   : > { %v2113_v14 = vpop.permute.xlu2 %2112 }
 0x269   : > { %v2115_v25 = vunpack.i.h.bf16 %v2113_v14  ;;  %v2114_v26 = vunpack.i.l.bf16 %v2113_v14 }
 0x26b   : > { %v799_v34 = vsel %vm646_vm5, %v2114_v26, %v2115_v25 }
 0x270   : > { %v806_v18 = vpop.permute.xlu2 %805 }
 0x278   : > { %v2128_v48 = vpop.permute.xlu2 %2127 }
 0x279   : > { %v2130_v58 = vunpack.i.h.bf16 %v2128_v48  ;;  %v2129_v59 = vunpack.i.l.bf16 %v2128_v48 }
 0x27b   : > { %v773_v0 = vsel %vm616_vm8, %v2130_v58, %v2129_v59 }
 0x280   : > { %v2108_v16 = vpop.permute.xlu1 %2107  ;;  %v2138_v63 = vpop.permute.xlu2 %2137 }
 0x281   : > { %v2103_v17 = vpop.permute.xlu0 %2102  ;;  %v2110_v19 = vunpack.i.h.bf16 %v2108_v16  ;;  %v2109_v20 = vunpack.i.l.bf16 %v2108_v16  ;;  %v2140_v2 = vunpack.i.h.bf16 %v2138_v63  ;;  %v2139_v3 = vunpack.i.l.bf16 %v2138_v63 }
 0x282   : > { %v2105_v22 = vunpack.i.h.bf16 %v2103_v17  ;;  %v2104_v24 = vunpack.i.l.bf16 %v2103_v17 }
 0x283   : > { %v808_v32 = vsel %vm656_vm4, %v2109_v20, %v2110_v19  ;;  %v807_v46 = vsel %vm656_vm4, %v2110_v19, %v806_v18  ;;  %v809_v47 = vsel %vm656_vm4, %v806_v18, %v2109_v20  ;;  %v755_v13 = vsel %vm596_vm10, %v2140_v2, %v2139_v3 }
 0x284   : > { %v817_v29 = vsel %vm666_vm3, %v2104_v24, %v2105_v22 }
 0x285   : > { %836 = vmatpush.msra.mxu3 %v817_v29 }
 0x287   : > { %837 = vmatpush.msra.mxu3 %v808_v32 }
 0x288   : > { %v815_v33 = vpop.permute.xlu1 %814  ;;  %v759_v19 = vpop.permute.xlu2 %758 }
 0x289   : > { %v2118_v35 = vpop.permute.xlu0 %2117  ;;  %838 = vmatpush.msra.mxu3 %v799_v34  ;;  %v816_v36 = vsel %vm666_vm3, %v2105_v22, %v815_v33  ;;  %v818_v40 = vsel %vm666_vm3, %v815_v33, %v2104_v24 }
 0x28a   : > { %v2120_v41 = vunpack.i.h.bf16 %v2118_v35  ;;  %v2119_v42 = vunpack.i.l.bf16 %v2118_v35  ;;  %856 = vmatpush.msrb.mxu0 %v816_v36  ;;  %876 = vmatpush.msrb.mxu1 %v818_v40 }
 0x28c   : > { %v790_v51 = vsel %vm636_vm6, %v2119_v42, %v2120_v41  ;;  %857 = vmatpush.msrb.mxu0 %v807_v46  ;;  %877 = vmatpush.msrb.mxu1 %v809_v47 }
 0x28d   : > { %839 = vmatpush.msra.mxu3 %v790_v51 }
 0x28f   : > { %840 = vmatpush.msra.mxu3 %v744_v7 }
 0x290   : > { %v797_v53 = vpop.permute.xlu1 %796 }
 0x291   : > { %v2123_v55 = vpop.permute.xlu0 %2122  ;;  %v798_v56 = vsel %vm646_vm5, %v2115_v25, %v797_v53  ;;  %v800_v57 = vsel %vm646_vm5, %v797_v53, %v2114_v26 }
 0x292   : > { %v2125_v60 = vunpack.i.h.bf16 %v2123_v55  ;;  %v2124_v61 = vunpack.i.l.bf16 %v2123_v55  ;;  %858 = vmatpush.msrb.mxu0 %v798_v56  ;;  %878 = vmatpush.msrb.mxu1 %v800_v57  ;;  %v3102_v56 = vld [vmem:[%s2812_s24 + $0x20] sm:$0xff] }
 0x294   : > { %v782_v62 = vsel %vm626_vm7, %v2125_v60, %v2124_v61 }
 0x295   : > { %841 = vmatpush.msra.mxu3 %v782_v62 }
 0x297   : > { %842 = vmatpush.msra.mxu3 %v773_v0 }
 0x298   : > { %v2133_v1 = vpop.permute.xlu1 %2132 }
 0x299   : > { %v2135_v4 = vunpack.i.h.bf16 %v2133_v1  ;;  %v2134_v5 = vunpack.i.l.bf16 %v2133_v1  ;;  %v788_v7 = vpop.permute.xlu0 %787 }
 0x29a   : > { %v789_v8 = vsel %vm636_vm6, %v2120_v41, %v788_v7  ;;  %v791_v9 = vsel %vm636_vm6, %v788_v7, %v2119_v42 }
 0x29b   : > { %859 = vmatpush.msrb.mxu0 %v789_v8  ;;  %879 = vmatpush.msrb.mxu1 %v791_v9  ;;  %v764_v10 = vsel %vm606_vm9, %v2135_v4, %v2134_v5  ;;  %v763_v20 = vsel %vm606_vm9, %v2134_v5, %v759_v19  ;;  %v762_v22 = vsel %vm606_vm9, %v759_v19, %v2135_v4 }
 0x29c   : > { %843 = vmatpush.msra.mxu3 %v764_v10 }
 0x29d   : > { %860 = vmatpush.msrb.mxu0 %v2967_v6  ;;  %880 = vmatpush.msrb.mxu1 %v2974_v12 }
 0x29e   : > { %844 = vmatpush.msra.mxu3 %v755_v13 }
 0x29f   : > { %1937 = vmatmul.msk.f32.vlgmr.msra.gmra.mxu3 %vm677_vm11, %v819_v11 }
 0x2a0   : > { %v768_v14 = vpop.permute.xlu1 %767 }
 0x2a1   : > { %v777_v16 = vpop.permute.xlu0 %776  ;;  %v772_v6 = vsel %vm616_vm8, %v2129_v59, %v768_v14  ;;  %v771_v12 = vsel %vm616_vm8, %v768_v14, %v2130_v58  ;;  %v504_v58 = vmul.f32 %v3102_v56, %v3102_v56  ;;  %v3109_v59 = vld [vmem:[%s2812_s24 + $0x28] sm:$0xff] }
 0x2a2   : > { %v781_v17 = vsel %vm626_vm7, %v2124_v61, %v777_v16  ;;  %v780_v18 = vsel %vm626_vm7, %v777_v16, %v2125_v60  ;;  %v505_v61 = vmul.f32 %v3109_v59, %v3109_v59 }
 0x2a3   : > { %861 = vmatpush.msrb.mxu0 %v781_v17  ;;  %881 = vmatpush.msrb.mxu1 %v780_v18 }
 0x2a5   : > { %862 = vmatpush.msrb.mxu0 %v772_v6  ;;  %882 = vmatpush.msrb.mxu1 %v771_v12 }
 0x2a7   : > { %863 = vmatpush.msrb.mxu0 %v763_v20  ;;  %883 = vmatpush.msrb.mxu1 %v762_v22 }
 0x2a8   : > { %v824_v29 = vpop.permute.xlu1 %823 }
 0x2a9   : > { %v750_v24 = vpop.permute.xlu0 %749 }
 0x2aa   : > { %v754_v25 = vsel %vm596_vm10, %v2139_v3, %v750_v24  ;;  %v753_v26 = vsel %vm596_vm10, %v750_v24, %v2140_v2 }
 0x2ab   : > { %864 = vmatpush.msrb.mxu0 %v754_v25  ;;  %884 = vmatpush.msrb.mxu1 %v753_v26 }
 0x2ac   : > { %1938 = vmatmul.msk.f32.vlgmr.msrb.gmra.mxu0 %vm677_vm11, %v819_v11  ;;  %1939 = vmatmul.msk.f32.vlgmr.msrb.gmra.mxu1 %vm677_vm11, %v819_v11 }
 0x322   : > { %v846_v32 = vpop.f32.mrf.mxu3 }
 0x323   : > { %v847_v33 = vadd.f32 %v846_v32, %v824_v29 }
 0x325   : > { %v889_v34 = vmul.f32 %v847_v33, %v2841_v37 }
 0x327   : > { %v892_v42 = vadd.f32 %v889_v34, %v2851_v43 }
 0x329   : > { %v866_v35 = vpop.f32.mrf.mxu0  ;;  %v886_v36 = vpop.f32.mrf.mxu1  ;;  %v3063_v52 = vmax.f32 %v892_v42, 0.0 }
 0x32a   : > { %v867_v40 = vadd.f32 %v866_v35, %v824_v29  ;;  %v887_v41 = vadd.f32 %v886_v36, %v824_v29 }
 0x32c   : > { %v890_v46 = vmul.f32 %v867_v40, %v2843_v38  ;;  %v891_v47 = vmul.f32 %v887_v41, %v2866_v49 }
 0x32e   : > { %v893_v48 = vadd.f32 %v890_v46, %v2854_v44  ;;  %v894_v51 = vadd.f32 %v891_v47, %v2869_v50  ;;  %v971_v44 = vld [vmem:[%s3852_s9] sm:$0xff]  ;;  %v3099_v50 = vld [vmem:[%s2812_s24 + $0x18] sm:$0xff] }
 0x32f   : > { %v503_v57 = vmul.f32 %v3099_v50, %v3099_v50  ;;  %v494_v60 = vadd.f32 %v3102_v56, %v3099_v50 }
 0x330   : > { %v3065_v53 = vmax.f32 %v893_v48, 0.0  ;;  %v3067_v55 = vmax.f32 %v894_v51, 0.0 }
 0x331   : > { %v510_v62 = vadd.f32 %v504_v58, %v503_v57  ;;  %v495_v63 = vadd.f32 %v494_v60, %v3109_v59 }
 0x332   : > { %965 = vrot.lane.b32.xlu0 %v3067_v55, %s2633_s28  ;;  %v2147_v43 = vpack.i.bf16 %v3065_v53, %v3063_v52 }
 0x333   : > { %v511_v0 = vadd.f32 %v510_v62, %v505_v61 }
 0x334   : > { %2148 = vrot.lane.b32.xlu1 %v2147_v43, %s2632_s27  ;;  %2143 = vrot.lane.b32.xlu2 %v2147_v43, %s2633_s28 }
 0x33a   : > { %2153 = vrot.lane.b32.xlu0 %v2147_v43, %s2631_s3 }
 0x33c   : > { %947 = vrot.lane.b32.xlu1 %v3067_v55, %s2631_s3  ;;  %956 = vrot.lane.b32.xlu2 %v3067_v55, %s2632_s27 }
 0x342   : > { %938 = vrot.lane.b32.xlu0 %v3067_v55, %s2636_s18 }
 0x344   : > { %2163 = vrot.lane.b32.xlu1 %v2147_v43, %s2637_s20  ;;  %2158 = vrot.lane.b32.xlu2 %v2147_v43, %s2636_s18 }
 0x34a   : > { %2168 = vrot.lane.b32.xlu0 %v2147_v43, %s2634_s14 }
 0x34c   : > { %920 = vrot.lane.b32.xlu1 %v3067_v55, %s2634_s14  ;;  %929 = vrot.lane.b32.xlu2 %v3067_v55, %s2637_s20 }
 0x352   : > { %911 = vrot.lane.b32.xlu0 %v3067_v55, %s2638_s26 }
 0x354   : > { %2178 = vrot.lane.b32.xlu1 %v2147_v43, %s2635_s13  ;;  %2173 = vrot.lane.b32.xlu2 %v2147_v43, %s2638_s26 }
 0x35c   : > { %902 = vrot.lane.b32.xlu2 %v3067_v55, %s2635_s13 }
 0x364   : > { %974 = vperm.xlu2 %2100, %v971_v44  }
 0x37c   : > { %496 = vadd.xlane.f32.xlu0 %v495_v63 }
 0x37e   : > { %512 = vadd.xlane.f32.xlu1 %v511_v0 }
 0x38e   : > { %v2144_v1 = vpop.permute.xlu2 %2143 }
 0x38f   : > { %v2146_v2 = vunpack.i.h.bf16 %v2144_v1  ;;  %v2145_v3 = vunpack.i.l.bf16 %v2144_v1 }
 0x391   : > { %v968_v4 = vsel %vm666_vm3, %v2145_v3, %v2146_v2 }
 0x392   : > { %987 = vmatpush.msrb.mxu2 %v968_v4 }
 0x396   : > { %v957_v5 = vpop.permute.xlu2 %956 }
 0x39e   : > { %v2159_v10 = vpop.permute.xlu2 %2158 }
 0x39f   : > { %v2161_v12 = vunpack.i.h.bf16 %v2159_v10  ;;  %v2160_v19 = vunpack.i.l.bf16 %v2159_v10  ;;  %v970_v10 = vld [vmem:[%s3851_s8] sm:$0xff] }
 0x3a1   : > { %v941_v33 = vsel %vm636_vm6, %v2160_v19, %v2161_v12 }
 0x3a4   : > { %v966_v7 = vpop.permute.xlu0 %965 }
 0x3a5   : > { %v969_v8 = vsel %vm666_vm3, %v966_v7, %v2145_v3  ;;  %v967_v9 = vsel %vm666_vm3, %v2146_v2, %v966_v7 }
 0x3a6   : > { %v2149_v11 = vpop.permute.xlu1 %2148  ;;  %1007 = vmatpush.msrb.mxu3 %v967_v9  ;;  %1027 = vmatpush.msra.mxu0 %v969_v8  ;;  %v930_v29 = vpop.permute.xlu2 %929 }
 0x3a7   : > { %v2151_v13 = vunpack.i.h.bf16 %v2149_v11  ;;  %v2150_v14 = vunpack.i.l.bf16 %v2149_v11 }
 0x3a9   : > { %v959_v16 = vsel %vm656_vm4, %v2150_v14, %v2151_v13  ;;  %v958_v17 = vsel %vm656_vm4, %v2151_v13, %v957_v5  ;;  %v960_v18 = vsel %vm656_vm4, %v957_v5, %v2150_v14 }
 0x3aa   : > { %988 = vmatpush.msrb.mxu2 %v959_v16  ;;  %1008 = vmatpush.msrb.mxu3 %v958_v17 }
 0x3ab   : > { %1028 = vmatpush.msra.mxu0 %v960_v18 }
 0x3ac   : > { %v2154_v6 = vpop.permute.xlu0 %2153 }
 0x3ad   : > { %v2156_v20 = vunpack.i.h.bf16 %v2154_v6  ;;  %v2155_v22 = vunpack.i.l.bf16 %v2154_v6 }
 0x3ae   : > { %v948_v24 = vpop.permute.xlu1 %947  ;;  %v2174_v51 = vpop.permute.xlu2 %2173 }
 0x3af   : > { %v950_v25 = vsel %vm646_vm5, %v2155_v22, %v2156_v20  ;;  %v949_v26 = vsel %vm646_vm5, %v2156_v20, %v948_v24  ;;  %v951_v32 = vsel %vm646_vm5, %v948_v24, %v2155_v22  ;;  %v2176_v44 = vunpack.i.h.bf16 %v2174_v51 }
 0x3b0   : > { %989 = vmatpush.msrb.mxu2 %v950_v25  ;;  %1009 = vmatpush.msrb.mxu3 %v949_v26  ;;  %v2175_v57 = vunpack.i.l.bf16 %v2174_v51 }
 0x3b1   : > { %1029 = vmatpush.msra.mxu0 %v951_v32 }
 0x3b2   : > { %990 = vmatpush.msrb.mxu2 %v941_v33  ;;  %v914_v1 = vsel %vm606_vm9, %v2175_v57, %v2176_v44 }
 0x3b4   : > { %v939_v34 = vpop.permute.xlu0 %938  ;;  %991 = vmatpush.msrb.mxu2 %v3063_v52 }
 0x3b5   : > { %v940_v35 = vsel %vm636_vm6, %v2161_v12, %v939_v34  ;;  %v942_v36 = vsel %vm636_vm6, %v939_v34, %v2160_v19 }
 0x3b6   : > { %v2164_v40 = vpop.permute.xlu1 %2163  ;;  %1010 = vmatpush.msrb.mxu3 %v940_v35  ;;  %1030 = vmatpush.msra.mxu0 %v942_v36  ;;  %v903_v9 = vpop.permute.xlu2 %902 }
 0x3b7   : > { %v2166_v41 = vunpack.i.h.bf16 %v2164_v40  ;;  %v2165_v42 = vunpack.i.l.bf16 %v2164_v40 }
 0x3b8   : > { %1011 = vmatpush.msrb.mxu3 %v3065_v53  ;;  %1031 = vmatpush.msra.mxu0 %v3067_v55 }
 0x3b9   : > { %v933_v46 = vsel %vm626_vm7, %v930_v29, %v2165_v42  ;;  %v932_v47 = vsel %vm626_vm7, %v2165_v42, %v2166_v41  ;;  %v931_v48 = vsel %vm626_vm7, %v2166_v41, %v930_v29 }
 0x3ba   : > { %992 = vmatpush.msrb.mxu2 %v933_v46  ;;  %1012 = vmatpush.msrb.mxu3 %v932_v47 }
 0x3bb   : > { %1032 = vmatpush.msra.mxu0 %v931_v48 }
 0x3bc   : > { %v2169_v43 = vpop.permute.xlu0 %2168 }
 0x3bd   : > { %v2171_v58 = vunpack.i.h.bf16 %v2169_v43  ;;  %v2170_v60 = vunpack.i.l.bf16 %v2169_v43 }
 0x3be   : > { %v921_v61 = vpop.permute.xlu1 %920 }
 0x3bf   : > { %v924_v62 = vsel %vm616_vm8, %v921_v61, %v2170_v60  ;;  %v923_v63 = vsel %vm616_vm8, %v2170_v60, %v2171_v58  ;;  %v922_v0 = vsel %vm616_vm8, %v2171_v58, %v921_v61 }
 0x3c0   : > { %993 = vmatpush.msrb.mxu2 %v924_v62  ;;  %1013 = vmatpush.msrb.mxu3 %v923_v63 }
 0x3c1   : > { %1033 = vmatpush.msra.mxu0 %v922_v0 }
 0x3c2   : > { %1014 = vmatpush.msrb.mxu3 %v914_v1 }
 0x3c4   : > { %v912_v2 = vpop.permute.xlu0 %911 }
 0x3c5   : > { %v915_v3 = vsel %vm606_vm9, %v912_v2, %v2175_v57  ;;  %v913_v4 = vsel %vm606_vm9, %v2176_v44, %v912_v2 }
 0x3c6   : > { %v2179_v5 = vpop.permute.xlu1 %2178  ;;  %994 = vmatpush.msrb.mxu2 %v915_v3  ;;  %1034 = vmatpush.msra.mxu0 %v913_v4 }
 0x3c7   : > { %v2181_v7 = vunpack.i.h.bf16 %v2179_v5  ;;  %v2180_v8 = vunpack.i.l.bf16 %v2179_v5 }
 0x3c9   : > { %v906_v11 = vsel %vm596_vm10, %v903_v9, %v2180_v8  ;;  %v905_v13 = vsel %vm596_vm10, %v2180_v8, %v2181_v7  ;;  %v904_v14 = vsel %vm596_vm10, %v2181_v7, %v903_v9 }
 0x3ca   : > { %995 = vmatpush.msrb.mxu2 %v906_v11  ;;  %1015 = vmatpush.msrb.mxu3 %v905_v13 }
 0x3cb   : > { %1035 = vmatpush.msra.mxu0 %v904_v14  ;;  %1940 = vmatmul.msk.f32.vlgmr.msrb.gmra.mxu2 %vm677_vm11, %v970_v10 }
 0x3cc   : > { %1941 = vmatmul.msk.f32.vlgmr.msrb.gmra.mxu3 %vm677_vm11, %v970_v10  ;;  %1942 = vmatmul.msk.f32.vlgmr.msra.gmra.mxu0 %vm677_vm11, %v970_v10 }
 0x3ef   : > { %v497_v16 = vpop.xlane.xlu0 %496 }
 0x3f0   : > { %v499_v17 = vmul.f32 0.005, %v497_v16 }
 0x3f1   : > { %v513_v18 = vpop.xlane.xlu1 %512 }
 0x3f2   : > { %v517_v6 = vmul.f32 %v499_v17, %v499_v17  ;;  %v515_v12 = vmul.f32 0.005, %v513_v18  ;;  %v524_v32 = vsub.f32 %v3102_v56, %v499_v17  ;;  %v525_v33 = vsub.f32 %v3109_v59, %v499_v17 }
 0x3f4   : > { %v519_v19 = vsub.f32 %v515_v12, %v517_v6 }
 0x3f6   : > { %v527_v20 = vadd.f32 1e-05, %v519_v19 }
 0x3f8   : > { %2425 = vrsqrt.f32 %v527_v20  ;;  %vm544_vm12 = vweird.f32 %v527_v20 }
 0x3fe   : > { %v2426_v22 = vpop.eup %2425 }
 0x3ff   : > { %v539_v24 = vmul.f32 %v2426_v22, %v527_v20  ;;  %vm545_vm13 = vweird.f32 %v2426_v22 }
 0x400   : > { %vm546_vm14 = vmor %vm544_vm12, %vm545_vm13 }
 0x401   : > { %v540_v25 = vmul.f32 %v2426_v22, %v539_v24 }
 0x403   : > { %v541_v26 = vmul.f32 0.5, %v540_v25 }
 0x405   : > { %v542_v29 = vsub.f32 1.5, %v541_v26 }
 0x407   : > { %v543_v34 = vmul.f32 %v2426_v22, %v542_v29 }
 0x409   : > { %v547_v35 = vsel %vm546_vm14, %v2426_v22, %v543_v34 }
 0x40a   : > { %v552_v36 = vmul.f32 %v547_v35, %v524_v32  ;;  %v553_v40 = vmul.f32 %v547_v35, %v525_v33 }
 0x40c   : > { %v566_v41 = vmul.f32 %v557_v28, %v552_v36  ;;  %v567_v42 = vmul.f32 %v558_v39, %v553_v40  ;;  %v523_v28 = vsub.f32 %v3099_v50, %v499_v17 }
 0x40e   : > { %v580_v46 = vadd.f32 %v571_v31, %v566_v41  ;;  %v581_v47 = vadd.f32 %v572_v45, %v567_v42  ;;  %v551_v31 = vmul.f32 %v547_v35, %v523_v28  ;;  %v975_v45 = vpop.permute.xlu2 %974 }
 0x410   : > { %v3184_v56 = vmul.f32 %v580_v46, %v2843_v38  ;;  %v3187_v59 = vmul.f32 %v581_v47, %v2866_v49  ;;  %v565_v39 = vmul.f32 %v556_v27, %v551_v31 }
 0x412   : > { %v2187_v48 = vpack.i.bf16 %v3187_v59, %v3184_v56  ;;  %v579_v43 = vadd.f32 %v570_v30, %v565_v39 }
 0x414   : > { %2188 = vrot.lane.b32.xlu0 %v2187_v48, %s2632_s27  ;;  %2183 = vrot.lane.b32.xlu2 %v2187_v48, %s2633_s28  ;;  %v3204_v58 = vmul.f32 %v579_v43, %v2841_v37 }
 0x41c   : > { %2193 = vrot.lane.b32.xlu0 %v2187_v48, %s2631_s3 }
 0x424   : > { %2243 = vrot.lane.b32.xlu0 %v2187_v48, %s2636_s18 }
 0x449   : > { %v1037_v51 = vpop.f32.mrf.mxu0 }
 0x44a   : > { %v1038_v44 = vadd.f32 %v1037_v51, %v975_v45 }
 0x44c   : > { %v3201_v57 = vmul.f32 %v1038_v44, %v2866_v49 }
 0x44e   : > { %v1045_v60 = vmax.f32 %v3201_v57, 0.0  ;;  %v997_v61 = vpop.f32.mrf.mxu2 }
 0x44f   : > { %v998_v50 = vadd.f32 %v997_v61, %v975_v45  ;;  %v1017_v62 = vpop.f32.mrf.mxu3 }
 0x450   : > { %v1018_v63 = vadd.f32 %v1017_v62, %v975_v45  ;;  %v2197_v21 = vpack.i.bf16 %v3204_v58, %v1045_v60 }
 0x451   : > { %v3211_v23 = vmul.f32 %v998_v50, %v2841_v37 }
 0x452   : > { %v3214_v27 = vmul.f32 %v1018_v63, %v2843_v38  ;;  %2198 = vrot.lane.b32.xlu2 %v2197_v21, %s2633_s28 }
 0x453   : > { %v1043_v30 = vmax.f32 %v3211_v23, 0.0 }
 0x454   : > { %v1044_v49 = vmax.f32 %v3214_v27, 0.0 }
 0x456   : > { %v2257_v0 = vpack.i.bf16 %v1044_v49, %v1043_v30 }
 0x458   : > { %2258 = vrot.lane.b32.xlu1 %v2257_v0, %s2636_s18  ;;  %2253 = vrot.lane.b32.xlu0 %v2257_v0, %s2631_s3 }
 0x45a   : > { %2203 = vrot.lane.b32.xlu2 %v2197_v21, %s2632_s27 }
 0x460   : > { %2273 = vrot.lane.b32.xlu1 %v2257_v0, %s2634_s14  ;;  %2263 = vrot.lane.b32.xlu0 %v2257_v0, %s2637_s20 }
 0x462   : > { %2208 = vrot.lane.b32.xlu2 %v2197_v21, %s2631_s3 }
 0x468   : > { %2278 = vrot.lane.b32.xlu1 %v2257_v0, %s2638_s26  ;;  %2268 = vrot.lane.b32.xlu0 %v2187_v48, %s2637_s20 }
 0x46a   : > { %2213 = vrot.lane.b32.xlu2 %v2197_v21, %s2636_s18 }
 0x46e   : > { %v2184_v37 = vpop.permute.xlu2 %2183 }
 0x46f   : > { %v2186_v38 = vunpack.i.h.bf16 %v2184_v37  ;;  %v2185_v1 = vunpack.i.l.bf16 %v2184_v37 }
 0x470   : > { %2283 = vrot.lane.b32.xlu1 %v2257_v0, %s2635_s13  ;;  %2298 = vrot.lane.b32.xlu0 %v2187_v48, %s2635_s13 }
 0x471   : > { %v3237_v2 = vsel %vm666_vm3, %v2185_v1, %v2186_v38 }
 0x472   : > { %2218 = vrot.lane.b32.xlu2 %v2197_v21, %s2637_s20 }
 0x478   : > { %2288 = vrot.lane.b32.xlu1 %v2187_v48, %s2634_s14 }
 0x47a   : > { %2223 = vrot.lane.b32.xlu2 %v2197_v21, %s2634_s14 }
 0x480   : > { %1276 = vperm.xlu1 %2141, %v2922_v15  }
 0x482   : > { %2228 = vrot.lane.b32.xlu2 %v2257_v0, %s2633_s28 }
 0x486   : > { %v2189_v3 = vpop.permute.xlu0 %2188 }
 0x487   : > { %v2191_v4 = vunpack.i.h.bf16 %v2189_v3  ;;  %v2190_v5 = vunpack.i.l.bf16 %v2189_v3 }
 0x489   : > { %v3246_v7 = vsel %vm656_vm4, %v2190_v5, %v2191_v4 }
 0x48a   : > { %2233 = vrot.lane.b32.xlu2 %v2257_v0, %s2632_s27 }
 0x48e   : > { %v3263_v17 = vpop.permute.xlu0 %2193 }
 0x48f   : > { %v2195_v6 = vunpack.i.l.bf16 %v3263_v17 }
 0x492   : > { %2238 = vrot.lane.b32.xlu2 %v2197_v21, %s2638_s26 }
 0x496   : > { %v3275_v20 = vpop.permute.xlu0 %2243 }
 0x497   : > { %v2245_v24 = vunpack.i.l.bf16 %v3275_v20 }
 0x49a   : > { %2248 = vrot.lane.b32.xlu2 %v2197_v21, %s2635_s13 }
 0x4a2   : > { %2293 = vrot.lane.b32.xlu2 %v2187_v48, %s2638_s26 }
 0x4ac   : > { %v2199_v8 = vpop.permute.xlu2 %2198 }
 0x4ad   : > { %v2201_v9 = vunpack.i.h.bf16 %v2199_v8  ;;  %v2200_v48 = vunpack.i.l.bf16 %v2199_v8 }
 0x4af   : > { %v1270_v15 = vsel %vm666_vm3, %v2201_v9, %v2185_v1  ;;  %v3255_v10 = vsel %vm666_vm3, %v2186_v38, %v2201_v9 }
 0x4b0   : > { %1289 = vmatpush.msrb.mxu0 %v1270_v15 }
 0x4b4   : > { %v2204_v11 = vpop.permute.xlu2 %2203 }
 0x4b5   : > { %v2206_v13 = vunpack.i.h.bf16 %v2204_v11  ;;  %v2205_v61 = vunpack.i.l.bf16 %v2204_v11 }
 0x4b7   : > { %v1261_v14 = vsel %vm656_vm4, %v2206_v13, %v2190_v5  ;;  %v3261_v16 = vsel %vm656_vm4, %v2191_v4, %v2206_v13 }
 0x4b8   : > { %1290 = vmatpush.msrb.mxu0 %v1261_v14 }
 0x4bc   : > { %v3265_v18 = vpop.permute.xlu2 %2208 }
 0x4bd   : > { %v2211_v12 = vunpack.i.h.bf16 %v3265_v18  ;;  %v2210_v1 = vunpack.i.l.bf16 %v3265_v18 }
 0x4bf   : > { %v1252_v19 = vsel %vm646_vm5, %v2211_v12, %v2195_v6 }
 0x4c0   : > { %1291 = vmatpush.msrb.mxu0 %v1252_v19 }
 0x4c4   : > { %v3277_v22 = vpop.permute.xlu2 %2213 }
 0x4c5   : > { %v2216_v25 = vunpack.i.h.bf16 %v3277_v22  ;;  %v2215_v8 = vunpack.i.l.bf16 %v3277_v22 }
 0x4c7   : > { %v1243_v26 = vsel %vm636_vm6, %v2216_v25, %v2245_v24 }
 0x4c8   : > { %1292 = vmatpush.msrb.mxu0 %v1243_v26 }
 0x4ca   : > { %1293 = vmatpush.msrb.mxu0 %v3204_v58  ;;  %v2259_v29 = vpop.permute.xlu1 %2258  ;;  %v2254_v32 = vpop.permute.xlu0 %2253 }
 0x4cb   : > { %v2256_v62 = vunpack.i.h.bf16 %v2254_v32  ;;  %v2255_v63 = vunpack.i.l.bf16 %v2254_v32  ;;  %v2261_v37 = vunpack.i.h.bf16 %v2259_v29  ;;  %v2260_v38 = vunpack.i.l.bf16 %v2259_v29 }
 0x4cc   : > { %v3288_v33 = vpop.permute.xlu2 %2218 }
 0x4cd   : > { %v2221_v42 = vunpack.i.h.bf16 %v3288_v33  ;;  %v1098_v9 = vsel %vm646_vm5, %v2255_v63, %v2256_v62  ;;  %v1097_v15 = vsel %vm646_vm5, %v2256_v62, %v2210_v1  ;;  %v1099_v14 = vsel %vm646_vm5, %v2210_v1, %v2255_v63 }
 0x4ce   : > { %v1089_v19 = vsel %vm636_vm6, %v2260_v38, %v2261_v37 }
 0x4d2   : > { %v3290_v34 = vpop.permute.xlu1 %2273  ;;  %v3292_v35 = vpop.permute.xlu0 %2263 }
 0x4d3   : > { %v2265_v11 = vunpack.i.l.bf16 %v3292_v35  ;;  %v2266_v26 = vunpack.i.h.bf16 %v3292_v35  ;;  %v2275_v35 = vunpack.i.l.bf16 %v3290_v34 }
 0x4d4   : > { %v3294_v36 = vpop.permute.xlu2 %2223 }
 0x4d5   : > { %v2226_v29 = vunpack.i.h.bf16 %v3294_v36  ;;  %v1080_v23 = vsel %vm626_vm7, %v2265_v11, %v2266_v26 }
 0x4da   : > { %v3296_v40 = vpop.permute.xlu1 %2278  ;;  %v3298_v41 = vpop.permute.xlu0 %2268 }
 0x4db   : > { %v2271_v46 = vunpack.i.h.bf16 %v3298_v41 }
 0x4dc   : > { %v2229_v47 = vpop.permute.xlu2 %2228 }
 0x4dd   : > { %v2231_v28 = vunpack.i.h.bf16 %v2229_v47  ;;  %v2230_v31 = vunpack.i.l.bf16 %v2229_v47  ;;  %v1235_v39 = vsel %vm626_vm7, %v2271_v46, %v2221_v42  ;;  %v1088_v47 = vsel %vm636_vm6, %v2261_v37, %v2215_v8 }
 0x4de   : > { %1294 = vmatpush.msrb.mxu0 %v1235_v39  ;;  %v2276_v39 = vunpack.i.h.bf16 %v3290_v34  ;;  %v2281_v34 = vunpack.i.h.bf16 %v3296_v40 }
 0x4df   : > { %v1116_v45 = vsel %vm666_vm3, %v2230_v31, %v2231_v28  ;;  %v1115_v51 = vsel %vm666_vm3, %v2231_v28, %v2200_v48  ;;  %v1117_v43 = vsel %vm666_vm3, %v2200_v48, %v2230_v31  ;;  %v2220_v48 = vunpack.i.l.bf16 %v3288_v33 }
 0x4e0   : > { %1135 = vmatpush.msra.mxu1 %v1116_v45  ;;  %1155 = vmatpush.msra.mxu2 %v1115_v51  ;;  %v1090_v31 = vsel %vm636_vm6, %v2215_v8, %v2260_v38  ;;  %v2225_v45 = vunpack.i.l.bf16 %v3294_v36  ;;  %v1071_v57 = vsel %vm616_vm8, %v2275_v35, %v2276_v39 }
 0x4e1   : > { %1175 = vmatpush.msra.mxu3 %v1117_v43  ;;  %v1081_v43 = vsel %vm626_vm7, %v2220_v48, %v2265_v11  ;;  %v1079_v27 = vsel %vm626_vm7, %v2266_v26, %v2220_v48 }
 0x4e2   : > { %v3314_v44 = vpop.permute.xlu1 %2283  ;;  %v2299_v8 = vpop.permute.xlu0 %2298 }
 0x4e4   : > { %v2234_v50 = vpop.permute.xlu2 %2233 }
 0x4e5   : > { %v2236_v21 = vunpack.i.h.bf16 %v2234_v50  ;;  %v2235_v0 = vunpack.i.l.bf16 %v2234_v50 }
 0x4e7   : > { %v1107_v3 = vsel %vm656_vm4, %v2235_v0, %v2236_v21  ;;  %v1106_v4 = vsel %vm656_vm4, %v2236_v21, %v2205_v61  ;;  %v1108_v5 = vsel %vm656_vm4, %v2205_v61, %v2235_v0  ;;  %v2280_v61 = vunpack.i.l.bf16 %v3296_v40 }
 0x4e8   : > { %1136 = vmatpush.msra.mxu1 %v1107_v3  ;;  %1156 = vmatpush.msra.mxu2 %v1106_v4  ;;  %v1072_v40 = vsel %vm616_vm8, %v2225_v45, %v2275_v35  ;;  %v3396_v3 = vld [vmem:[%s3853_s10] sm:$0xff]  ;;  %v2196_v4 = vunpack.i.h.bf16 %v3263_v17 }
 0x4e9   : > { %1176 = vmatpush.msra.mxu3 %v1108_v5  ;;  %v1062_v63 = vsel %vm606_vm9, %v2280_v61, %v2281_v34 }
 0x4ea   : > { %v3329_v13 = vpop.permute.xlu1 %2288  ;;  %1137 = vmatpush.msra.mxu1 %v1098_v9  ;;  %1157 = vmatpush.msra.mxu2 %v1097_v15  ;;  %v1253_v5 = vsel %vm646_vm5, %v2196_v4, %v2211_v12  ;;  %v1251_v18 = vsel %vm646_vm5, %v2195_v6, %v2196_v4  ;;  %v2301_v6 = vunpack.i.h.bf16 %v2299_v8 }
 0x4eb   : > { %v2291_v32 = vunpack.i.h.bf16 %v3329_v13  ;;  %1177 = vmatpush.msra.mxu3 %v1099_v14  ;;  %v2290_v22 = vunpack.i.l.bf16 %v3329_v13 }
 0x4ec   : > { %v3341_v28 = vpop.permute.xlu2 %2238  ;;  %1138 = vmatpush.msra.mxu1 %v1089_v19  ;;  %1158 = vmatpush.msra.mxu2 %v1088_v47  ;;  %v2300_v19 = vunpack.i.l.bf16 %v2299_v8 }
 0x4ed   : > { %1178 = vmatpush.msra.mxu3 %v1090_v31  ;;  %v1226_v51 = vsel %vm616_vm8, %v2291_v32, %v2226_v29  ;;  %v2240_v50 = vunpack.i.l.bf16 %v3341_v28  ;;  %v1225_v26 = vsel %vm616_vm8, %v2226_v29, %v2290_v22 }
 0x4ee   : > { %1139 = vmatpush.msra.mxu1 %v1043_v30  ;;  %1159 = vmatpush.msra.mxu2 %v1044_v49  ;;  %v2286_v30 = vunpack.i.h.bf16 %v3314_v44  ;;  %v2285_v49 = vunpack.i.l.bf16 %v3314_v44  ;;  %v1206_v13 = vsel %vm596_vm10, %v2300_v19, %v2301_v6 }
 0x4ef   : > { %1179 = vmatpush.msra.mxu3 %v1045_v60  ;;  %1295 = vmatpush.msrb.mxu0 %v1226_v51  ;;  %v1070_v60 = vsel %vm616_vm8, %v2276_v39, %v2225_v45  ;;  %v1063_v62 = vsel %vm606_vm9, %v2240_v50, %v2280_v61  ;;  %v1061_v21 = vsel %vm606_vm9, %v2281_v34, %v2240_v50  ;;  %v3469_v39 = vld [vmem:[#allocation5] sm:$0xff]  ;;  %v3472_v51 = vld [vmem:[#allocation5 + $0x8] sm:$0xff] }
 0x4f0   : > { %1140 = vmatpush.msra.mxu1 %v1081_v43  ;;  %1160 = vmatpush.msra.mxu2 %v1080_v23  ;;  %v1053_v37 = vsel %vm596_vm10, %v2285_v49, %v2286_v30 }
 0x4f1   : > { %1180 = vmatpush.msra.mxu3 %v1079_v27 }
 0x4f2   : > { %1141 = vmatpush.msra.mxu1 %v1072_v40  ;;  %1161 = vmatpush.msra.mxu2 %v1071_v57  ;;  %v1277_v48 = vpop.permute.xlu1 %1276 }
 0x4f3   : > { %1181 = vmatpush.msra.mxu3 %v1070_v60 }
 0x4f4   : > { %v3381_v44 = vpop.permute.xlu2 %2248  ;;  %1142 = vmatpush.msra.mxu1 %v1063_v62  ;;  %1162 = vmatpush.msra.mxu2 %v1062_v63 }
 0x4f5   : > { %v2250_v0 = vunpack.i.l.bf16 %v3381_v44  ;;  %1182 = vmatpush.msra.mxu3 %v1061_v21  ;;  %v2251_v9 = vunpack.i.h.bf16 %v3381_v44 }
 0x4f6   : > { %1163 = vmatpush.msra.mxu2 %v1053_v37 }
 0x4f7   : > { %v1054_v38 = vsel %vm596_vm10, %v2250_v0, %v2285_v49  ;;  %v1052_v1 = vsel %vm596_vm10, %v2286_v30, %v2250_v0  ;;  %1944 = vmatmul.msk.f32.vlgmr.msra.gmra.mxu2 %vm677_vm11, %v3396_v3  ;;  %v1208_v14 = vsel %vm596_vm10, %v2301_v6, %v2251_v9  ;;  %v3481_v30 = vld [vmem:[#allocation5 + $0x10] sm:$0xff] }
 0x4f8   : > { %1329 = vmatpush.msrb.mxu2 %v3255_v10  ;;  %1143 = vmatpush.msra.mxu1 %v1054_v38  ;;  %v2246_v10 = vunpack.i.h.bf16 %v3275_v20  ;;  %v1272_v20 = vld [vmem:[%s3847_s4] sm:$0xff] }
 0x4f9   : > { %1183 = vmatpush.msra.mxu3 %v1052_v1  ;;  %1943 = vmatmul.msk.f32.vlgmr.msra.gmra.mxu1 %vm677_vm11, %v3396_v3 }
 0x4fa   : > { %1309 = vmatpush.msrb.mxu1 %v3237_v2  ;;  %1330 = vmatpush.msrb.mxu2 %v3261_v16  ;;  %v2270_v2 = vunpack.i.l.bf16 %v3298_v41  ;;  %v1244_v12 = vsel %vm636_vm6, %v2246_v10, %v2216_v25  ;;  %v1242_v17 = vsel %vm636_vm6, %v2245_v24, %v2246_v10 }
 0x4fb   : > { %1945 = vmatmul.msk.f32.vlgmr.msra.gmra.mxu3 %vm677_vm11, %v3396_v3 }
 0x4fc   : > { %1310 = vmatpush.msrb.mxu1 %v3246_v7  ;;  %1331 = vmatpush.msrb.mxu2 %v1253_v5  ;;  %v2294_v16 = vpop.permute.xlu2 %2293  ;;  %v2241_v7 = vunpack.i.h.bf16 %v3341_v28  ;;  %v1233_v11 = vsel %vm626_vm7, %v2270_v2, %v2271_v46  ;;  %v1234_v41 = vsel %vm626_vm7, %v2221_v42, %v2270_v2  ;;  %v1224_v46 = vsel %vm616_vm8, %v2290_v22, %v2291_v32 }
 0x4fd   : > { %v2296_v15 = vunpack.i.h.bf16 %v2294_v16  ;;  %v2295_v24 = vunpack.i.l.bf16 %v2294_v16  ;;  %v1207_v32 = vsel %vm596_vm10, %v2251_v9, %v2300_v19 }
 0x4fe   : > { %1311 = vmatpush.msrb.mxu1 %v1251_v18  ;;  %1332 = vmatpush.msrb.mxu2 %v1244_v12 }
 0x4ff   : > { %v1217_v25 = vsel %vm606_vm9, %v2296_v15, %v2241_v7  ;;  %v1215_v33 = vsel %vm606_vm9, %v2295_v24, %v2296_v15  ;;  %v1216_v42 = vsel %vm606_vm9, %v2241_v7, %v2295_v24  ;;  %v1421_v15 = vld [vmem:[%s3850_s7] sm:$0xff] }
 0x500   : > { %1312 = vmatpush.msrb.mxu1 %v1242_v17  ;;  %1333 = vmatpush.msrb.mxu2 %v3187_v59 }
 0x501   : > { %1296 = vmatpush.msrb.mxu0 %v1217_v25 }
 0x502   : > { %1313 = vmatpush.msrb.mxu1 %v3184_v56  ;;  %1334 = vmatpush.msrb.mxu2 %v1233_v11 }
 0x503   : > { %1297 = vmatpush.msrb.mxu0 %v1208_v14 }
 0x504   : > { %1946 = vmatmul.msk.f32.vlgmr.msrb.gmra.mxu0 %vm677_vm11, %v1272_v20  ;;  %1314 = vmatpush.msrb.mxu1 %v1234_v41 }
 0x505   : > { %1335 = vmatpush.msrb.mxu2 %v1224_v46 }
 0x506   : > { %1315 = vmatpush.msrb.mxu1 %v1225_v26 }
 0x507   : > { %1336 = vmatpush.msrb.mxu2 %v1215_v33 }
 0x508   : > { %1316 = vmatpush.msrb.mxu1 %v1216_v42 }
 0x509   : > { %1337 = vmatpush.msrb.mxu2 %v1206_v13 }
 0x50a   : > { %1948 = vmatmul.msk.f32.vlgmr.msrb.gmra.mxu2 %vm677_vm11, %v1272_v20  ;;  %1317 = vmatpush.msrb.mxu1 %v1207_v32 }
 0x50b   : > { %1947 = vmatmul.msk.f32.vlgmr.msrb.gmra.mxu1 %vm677_vm11, %v1272_v20 }
 0x576   : > { %v3465_v36 = vpop.f32.mrf.mxu1 }
 0x57a   : > { %v3467_v47 = vpop.f32.mrf.mxu2 }
 0x581   : > { %v1299_v29 = vpop.f32.mrf.mxu0 }
 0x582   : > { %v1300_v28 = vadd.f32 %v1299_v29, %v1277_v48 }
 0x584   : > { %v1342_v35 = vmul.f32 %v3469_v39, %v1300_v28 }
 0x586   : > { %v1345_v34 = vmax.f32 %v1342_v35, 0.0 }
 0x588   : > { %v1319_v31 = vpop.f32.mrf.mxu1 }
 0x589   : > { %v1320_v45 = vadd.f32 %v1319_v31, %v1277_v48 }
 0x58b   : > { %v1343_v43 = vmul.f32 %v3472_v51, %v1320_v45 }
 0x58d   : > { %v3475_v61 = vmax.f32 %v1343_v43, 0.0  ;;  %v1339_v50 = vpop.f32.mrf.mxu2 }
 0x58e   : > { %v1340_v23 = vadd.f32 %v1339_v50, %v1277_v48 }
 0x58f   : > { %v2312_v27 = vpack.i.bf16 %v3475_v61, %v1345_v34 }
 0x590   : > { %v1344_v49 = vmul.f32 %v3481_v30, %v1340_v23 }
 0x591   : > { %2313 = vrot.lane.b32.xlu1 %v2312_v27, %s2631_s3  ;;  %2308 = vrot.lane.b32.xlu0 %v2312_v27, %s2632_s27 }
 0x592   : > { %2303 = vrot.lane.b32.xlu2 %v2312_v27, %s2633_s28  ;;  %v3484_v40 = vmax.f32 %v1344_v49, 0.0 }
 0x594   : > { %v2327_v57 = vpack.i.bf16 %v3484_v40, %v1345_v34 }
 0x599   : > { %1406 = vrot.lane.b32.xlu1 %v3484_v40, %s2632_s27  ;;  %1415 = vrot.lane.b32.xlu0 %v3484_v40, %s2633_s28 }
 0x59a   : > { %2318 = vrot.lane.b32.xlu2 %v2312_v27, %s2636_s18 }
 0x5a1   : > { %2328 = vrot.lane.b32.xlu1 %v2327_v57, %s2634_s14  ;;  %1397 = vrot.lane.b32.xlu0 %v3484_v40, %s2631_s3 }
 0x5a2   : > { %2323 = vrot.lane.b32.xlu2 %v2327_v57, %s2637_s20 }
 0x5a9   : > { %2338 = vrot.lane.b32.xlu1 %v2327_v57, %s2635_s13  ;;  %2333 = vrot.lane.b32.xlu0 %v2327_v57, %s2638_s26 }
 0x5aa   : > { %1388 = vrot.lane.b32.xlu2 %v3484_v40, %s2636_s18 }
 0x5b1   : > { %1359 = vrot.lane.b32.xlu1 %v3475_v61, %s2638_s26  ;;  %1368 = vrot.lane.b32.xlu0 %v3475_v61, %s2634_s14 }
 0x5b2   : > { %1377 = vrot.lane.b32.xlu2 %v3475_v61, %s2637_s20 }
 0x5b9   : > { %1424 = vperm.xlu0 %2342, %v1421_v15  }
 0x5ba   : > { %1350 = vrot.lane.b32.xlu2 %v3475_v61, %s2635_s13 }
 0x5ec   : > { %v2304_v60 = vpop.permute.xlu2 %2303 }
 0x5ed   : > { %v2306_v62 = vunpack.i.h.bf16 %v2304_v60  ;;  %v2305_v63 = vunpack.i.l.bf16 %v2304_v60 }
 0x5ef   : > { %v1418_v44 = vsel %vm666_vm3, %v2305_v63, %v2306_v62 }
 0x5f0   : > { %1437 = vmatpush.msrb.mxu3 %v1418_v44 }
 0x5f4   : > { %v2319_v21 = vpop.permute.xlu2 %2318 }
 0x5f5   : > { %v2321_v2 = vunpack.i.h.bf16 %v2319_v21  ;;  %v2320_v8 = vunpack.i.l.bf16 %v2319_v21 }
 0x5f7   : > { %v1391_v9 = vsel %vm636_vm6, %v2320_v8, %v2321_v2 }
 0x5fc   : > { %v2324_v0 = vpop.permute.xlu2 %2323 }
 0x5fd   : > { %v2326_v12 = vunpack.i.h.bf16 %v2324_v0  ;;  %v2325_v7 = vunpack.i.l.bf16 %v2324_v0 }
 0x5ff   : > { %v1383_v20 = vsel %vm626_vm7, %v2326_v12, %v2325_v7 }
 0x603   : > { %v2314_v37 = vpop.permute.xlu1 %2313  ;;  %v2309_v38 = vpop.permute.xlu0 %2308 }
 0x604   : > { %v2316_v1 = vunpack.i.h.bf16 %v2314_v37  ;;  %v2315_v4 = vunpack.i.l.bf16 %v2314_v37  ;;  %v2311_v10 = vunpack.i.h.bf16 %v2309_v38  ;;  %v2310_v5 = vunpack.i.l.bf16 %v2309_v38  ;;  %v1389_v11 = vpop.permute.xlu2 %1388  ;;  %v3567_v38 = vpop.f32.mrf.mxu3 }
 0x605   : > { %v1390_v32 = vsel %vm636_vm6, %v2321_v2, %v1389_v11  ;;  %v1392_v48 = vsel %vm636_vm6, %v1389_v11, %v2320_v8 }
 0x606   : > { %v1409_v16 = vsel %vm656_vm4, %v2310_v5, %v2311_v10  ;;  %v1400_v18 = vsel %vm646_vm5, %v2315_v4, %v2316_v1 }
 0x607   : > { %1438 = vmatpush.msrb.mxu3 %v1409_v16 }
 0x609   : > { %1439 = vmatpush.msrb.mxu3 %v1400_v18 }
 0x60b   : > { %v1407_v17 = vpop.permute.xlu1 %1406  ;;  %v1416_v6 = vpop.permute.xlu0 %1415  ;;  %1440 = vmatpush.msrb.mxu3 %v1391_v9 }
 0x60c   : > { %v1417_v22 = vsel %vm666_vm3, %v2306_v62, %v1416_v6  ;;  %v1419_v25 = vsel %vm666_vm3, %v1416_v6, %v2305_v63  ;;  %v1408_v24 = vsel %vm656_vm4, %v2311_v10, %v1407_v17  ;;  %v1410_v14 = vsel %vm656_vm4, %v1407_v17, %v2310_v5  ;;  %v1378_v29 = vpop.permute.xlu2 %1377 }
 0x60d   : > { %1441 = vmatpush.msrb.mxu3 %v1345_v34  ;;  %1457 = vmatpush.msra.mxu0 %v1417_v22  ;;  %v1382_v28 = vsel %vm626_vm7, %v2325_v7, %v1378_v29  ;;  %v1381_v45 = vsel %vm626_vm7, %v1378_v29, %v2326_v12 }
 0x60e   : > { %1477 = vmatpush.msra.mxu1 %v1419_v25 }
 0x60f   : > { %1442 = vmatpush.msrb.mxu3 %v1383_v20  ;;  %1458 = vmatpush.msra.mxu0 %v1408_v24 }
 0x610   : > { %1478 = vmatpush.msra.mxu1 %v1410_v14 }
 0x613   : > { %v2329_v41 = vpop.permute.xlu1 %2328  ;;  %v1398_v19 = vpop.permute.xlu0 %1397 }
 0x614   : > { %v2331_v46 = vunpack.i.h.bf16 %v2329_v41  ;;  %v2330_v26 = vunpack.i.l.bf16 %v2329_v41  ;;  %v1399_v33 = vsel %vm646_vm5, %v2316_v1, %v1398_v19  ;;  %v1401_v42 = vsel %vm646_vm5, %v1398_v19, %v2315_v4  ;;  %v1351_v21 = vpop.permute.xlu2 %1350 }
 0x615   : > { %1459 = vmatpush.msra.mxu0 %v1399_v33  ;;  %1479 = vmatpush.msra.mxu1 %v1401_v42 }
 0x616   : > { %v1374_v13 = vsel %vm616_vm8, %v2331_v46, %v2330_v26 }
 0x617   : > { %1443 = vmatpush.msrb.mxu3 %v1374_v13  ;;  %1460 = vmatpush.msra.mxu0 %v1390_v32 }
 0x618   : > { %1480 = vmatpush.msra.mxu1 %v1392_v48 }
 0x619   : > { %1461 = vmatpush.msra.mxu0 %v3475_v61  ;;  %v1420_v61 = vld [vmem:[%s3849_s6] sm:$0xff] }
 0x61a   : > { %1481 = vmatpush.msra.mxu1 %v3484_v40 }
 0x61b   : > { %v2339_v31 = vpop.permute.xlu1 %2338  ;;  %v2334_v35 = vpop.permute.xlu0 %2333  ;;  %1462 = vmatpush.msra.mxu0 %v1382_v28 }
 0x61c   : > { %v2341_v43 = vunpack.i.h.bf16 %v2339_v31  ;;  %v2340_v34 = vunpack.i.l.bf16 %v2339_v31  ;;  %v2336_v50 = vunpack.i.h.bf16 %v2334_v35  ;;  %v2335_v23 = vunpack.i.l.bf16 %v2334_v35  ;;  %1482 = vmatpush.msra.mxu1 %v1381_v45 }
 0x61e   : > { %v1365_v27 = vsel %vm606_vm9, %v2336_v50, %v2335_v23  ;;  %v1356_v49 = vsel %vm596_vm10, %v2341_v43, %v2340_v34  ;;  %v1355_v0 = vsel %vm596_vm10, %v2340_v34, %v1351_v21  ;;  %v1354_v37 = vsel %vm596_vm10, %v1351_v21, %v2341_v43 }
 0x61f   : > { %1444 = vmatpush.msrb.mxu3 %v1365_v27 }
 0x621   : > { %1445 = vmatpush.msrb.mxu3 %v1356_v49 }
 0x622   : > { %1949 = vmatmul.msk.f32.vlgmr.msrb.gmra.mxu3 %vm677_vm11, %v1420_v61 }
 0x623   : > { %v1360_v40 = vpop.permute.xlu1 %1359  ;;  %v1369_v57 = vpop.permute.xlu0 %1368 }
 0x624   : > { %v1373_v60 = vsel %vm616_vm8, %v2330_v26, %v1369_v57  ;;  %v1372_v62 = vsel %vm616_vm8, %v1369_v57, %v2331_v46  ;;  %v1364_v63 = vsel %vm606_vm9, %v2335_v23, %v1360_v40  ;;  %v1363_v44 = vsel %vm606_vm9, %v1360_v40, %v2336_v50 }
 0x625   : > { %1463 = vmatpush.msra.mxu0 %v1373_v60  ;;  %1483 = vmatpush.msra.mxu1 %v1372_v62 }
 0x627   : > { %1464 = vmatpush.msra.mxu0 %v1364_v63  ;;  %1484 = vmatpush.msra.mxu1 %v1363_v44 }
 0x629   : > { %1465 = vmatpush.msra.mxu0 %v1355_v0  ;;  %1485 = vmatpush.msra.mxu1 %v1354_v37 }
 0x62a   : > { %1950 = vmatmul.msk.f32.vlgmr.msra.gmra.mxu0 %vm677_vm11, %v1420_v61  ;;  %1951 = vmatmul.msk.f32.vlgmr.msra.gmra.mxu1 %vm677_vm11, %v1420_v61 }
 0x62b   : > { %v1425_v1 = vpop.permute.xlu0 %1424 }
 0x6a5   : > { %v1447_v4 = vpop.f32.mrf.mxu3 }
 0x6a6   : > { %v1448_v10 = vadd.f32 %v1447_v4, %v1425_v1 }
 0x6a7   : > { %v1467_v5 = vpop.f32.mrf.mxu0  ;;  %v1487_v2 = vpop.f32.mrf.mxu1 }
 0x6a8   : > { %v1490_v8 = vmul.f32 %v3469_v39, %v1448_v10  ;;  %v1468_v16 = vadd.f32 %v1467_v5, %v1425_v1  ;;  %v1488_v18 = vadd.f32 %v1487_v2, %v1425_v1 }
 0x6aa   : > { %v1493_v12 = vadd.f32 %v1490_v8, %v3204_v58  ;;  %v1491_v7 = vmul.f32 %v3472_v51, %v1468_v16  ;;  %v1492_v9 = vmul.f32 %v3481_v30, %v1488_v18 }
 0x6ac   : > { %v1494_v15 = vadd.f32 %v1491_v7, %v3184_v56  ;;  %v1495_v17 = vadd.f32 %v1492_v9, %v3187_v59  ;;  %v3575_v6 = vmax.f32 %v1493_v12, 0.0  ;;  %v1572_v56 = vld [vmem:[%s3852_s9] sm:$0xff] }
 0x6ae   : > { %v3577_v22 = vmax.f32 %v1494_v15, 0.0  ;;  %v3579_v25 = vmax.f32 %v1495_v17, 0.0 }
 0x6b0   : > { %1566 = vrot.lane.b32.xlu2 %v3579_v25, %s2633_s28  ;;  %v2353_v58 = vpack.i.bf16 %v3577_v22, %v3575_v6 }
 0x6b2   : > { %2354 = vrot.lane.b32.xlu0 %v2353_v58, %s2631_s3  ;;  %2344 = vrot.lane.b32.xlu1 %v2353_v58, %s2633_s28 }
 0x6b8   : > { %1557 = vrot.lane.b32.xlu2 %v3579_v25, %s2632_s27 }
 0x6ba   : > { %1539 = vrot.lane.b32.xlu0 %v3579_v25, %s2636_s18  ;;  %2349 = vrot.lane.b32.xlu1 %v2353_v58, %s2632_s27 }
 0x6c0   : > { %2359 = vrot.lane.b32.xlu2 %v2353_v58, %s2636_s18 }
 0x6c2   : > { %2369 = vrot.lane.b32.xlu0 %v2353_v58, %s2634_s14  ;;  %1548 = vrot.lane.b32.xlu1 %v3579_v25, %s2631_s3 }
 0x6c8   : > { %1530 = vrot.lane.b32.xlu2 %v3579_v25, %s2637_s20 }
 0x6ca   : > { %1512 = vrot.lane.b32.xlu0 %v3579_v25, %s2638_s26  ;;  %2364 = vrot.lane.b32.xlu1 %v2353_v58, %s2637_s20 }
 0x6d0   : > { %2374 = vrot.lane.b32.xlu2 %v2353_v58, %s2638_s26 }
 0x6d2   : > { %1575 = vperm.xlu0 %2342, %v1572_v56   ;;  %1521 = vrot.lane.b32.xlu1 %v3579_v25, %s2634_s14 }
 0x6d8   : > { %1503 = vrot.lane.b32.xlu2 %v3579_v25, %s2635_s13 }
 0x6da   : > { %2379 = vrot.lane.b32.xlu1 %v2353_v58, %s2635_s13 }
 0x70a   : > { %v1567_v59 = vpop.permute.xlu2 %1566 }
 0x712   : > { %v1558_v11 = vpop.permute.xlu2 %1557 }
 0x71a   : > { %v2360_v19 = vpop.permute.xlu2 %2359 }
 0x71b   : > { %v2362_v28 = vunpack.i.h.bf16 %v2360_v19  ;;  %v2361_v31 = vunpack.i.l.bf16 %v2360_v19 }
 0x71d   : > { %v1542_v27 = vsel %vm636_vm6, %v2361_v31, %v2362_v28 }
 0x722   : > { %v1531_v50 = vpop.permute.xlu2 %1530 }
 0x724   : > { %v2345_v20 = vpop.permute.xlu1 %2344  ;;  %v2355_v41 = vpop.permute.xlu0 %2354 }
 0x725   : > { %v2347_v24 = vunpack.i.h.bf16 %v2345_v20  ;;  %v2346_v14 = vunpack.i.l.bf16 %v2345_v20  ;;  %v2357_v13 = vunpack.i.h.bf16 %v2355_v41  ;;  %v2356_v32 = vunpack.i.l.bf16 %v2355_v41 }
 0x727   : > { %v1569_v46 = vsel %vm666_vm3, %v2346_v14, %v2347_v24  ;;  %v1568_v26 = vsel %vm666_vm3, %v2347_v24, %v1567_v59  ;;  %v1570_v33 = vsel %vm666_vm3, %v1567_v59, %v2346_v14  ;;  %v1551_v23 = vsel %vm646_vm5, %v2356_v32, %v2357_v13  ;;  %v1571_v24 = vld [vmem:[%s3851_s8] sm:$0xff] }
 0x728   : > { %1588 = vmatpush.msra.mxu2 %v1569_v46  ;;  %1608 = vmatpush.msra.mxu3 %v1568_v26 }
 0x729   : > { %1628 = vmatpush.msrb.mxu0 %v1570_v33 }
 0x72a   : > { %v2375_v63 = vpop.permute.xlu2 %2374 }
 0x72b   : > { %v2377_v4 = vunpack.i.h.bf16 %v2375_v63  ;;  %v2376_v10 = vunpack.i.l.bf16 %v2375_v63 }
 0x72c   : > { %v2350_v42 = vpop.permute.xlu1 %2349  ;;  %v1540_v34 = vpop.permute.xlu0 %1539 }
 0x72d   : > { %v2352_v29 = vunpack.i.h.bf16 %v2350_v42  ;;  %v2351_v48 = vunpack.i.l.bf16 %v2350_v42  ;;  %v1541_v57 = vsel %vm636_vm6, %v2362_v28, %v1540_v34  ;;  %v1543_v60 = vsel %vm636_vm6, %v1540_v34, %v2361_v31 }
 0x72e   : > { %v1515_v18 = vsel %vm606_vm9, %v2376_v10, %v2377_v4 }
 0x72f   : > { %v1560_v35 = vsel %vm656_vm4, %v2351_v48, %v2352_v29  ;;  %v1559_v45 = vsel %vm656_vm4, %v2352_v29, %v1558_v11  ;;  %v1561_v43 = vsel %vm656_vm4, %v1558_v11, %v2351_v48 }
 0x730   : > { %1589 = vmatpush.msra.mxu2 %v1560_v35  ;;  %1609 = vmatpush.msra.mxu3 %v1559_v45 }
 0x731   : > { %1629 = vmatpush.msrb.mxu0 %v1561_v43 }
 0x732   : > { %1590 = vmatpush.msra.mxu2 %v1551_v23  ;;  %v1504_v20 = vpop.permute.xlu2 %1503 }
 0x734   : > { %v1549_v61 = vpop.permute.xlu1 %1548  ;;  %1591 = vmatpush.msra.mxu2 %v1542_v27  ;;  %v2370_v62 = vpop.permute.xlu0 %2369 }
 0x735   : > { %v1550_v49 = vsel %vm646_vm5, %v2357_v13, %v1549_v61  ;;  %v1552_v40 = vsel %vm646_vm5, %v1549_v61, %v2356_v32  ;;  %v2372_v21 = vunpack.i.h.bf16 %v2370_v62  ;;  %v2371_v0 = vunpack.i.l.bf16 %v2370_v62 }
 0x736   : > { %1592 = vmatpush.msra.mxu2 %v3575_v6  ;;  %1610 = vmatpush.msra.mxu3 %v1550_v49 }
 0x737   : > { %1630 = vmatpush.msrb.mxu0 %v1552_v40  ;;  %v1524_v16 = vsel %vm616_vm8, %v2371_v0, %v2372_v21 }
 0x738   : > { %1611 = vmatpush.msra.mxu3 %v1541_v57 }
 0x739   : > { %1631 = vmatpush.msrb.mxu0 %v1543_v60 }
 0x73a   : > { %1612 = vmatpush.msra.mxu3 %v3577_v22 }
 0x73b   : > { %1632 = vmatpush.msrb.mxu0 %v3579_v25 }
 0x73c   : > { %v2365_v44 = vpop.permute.xlu1 %2364  ;;  %v1513_v12 = vpop.permute.xlu0 %1512 }
 0x73d   : > { %v2367_v37 = vunpack.i.h.bf16 %v2365_v44  ;;  %v2366_v1 = vunpack.i.l.bf16 %v2365_v44  ;;  %v1516_v17 = vsel %vm606_vm9, %v1513_v12, %v2376_v10  ;;  %v1514_v58 = vsel %vm606_vm9, %v2377_v4, %v1513_v12 }
 0x73f   : > { %v1534_v5 = vsel %vm626_vm7, %v1531_v50, %v2366_v1  ;;  %v1533_v2 = vsel %vm626_vm7, %v2366_v1, %v2367_v37  ;;  %v1532_v8 = vsel %vm626_vm7, %v2367_v37, %v1531_v50  ;;  %v1119_v50 = vld [vmem:[%s3854_s11] sm:$0xff] }
 0x740   : > { %1593 = vmatpush.msra.mxu2 %v1534_v5  ;;  %1613 = vmatpush.msra.mxu3 %v1533_v2 }
 0x741   : > { %1633 = vmatpush.msrb.mxu0 %v1532_v8 }
 0x742   : > { %1614 = vmatpush.msra.mxu3 %v1524_v16 }
 0x744   : > { %v1522_v7 = vpop.permute.xlu1 %1521  ;;  %1615 = vmatpush.msra.mxu3 %v1515_v18  ;;  %v1576_v46 = vpop.permute.xlu0 %1575 }
 0x745   : > { %v1525_v9 = vsel %vm616_vm8, %v1522_v7, %v2371_v0  ;;  %v1523_v15 = vsel %vm616_vm8, %v2372_v21, %v1522_v7 }
 0x746   : > { %1594 = vmatpush.msra.mxu2 %v1525_v9  ;;  %1634 = vmatpush.msrb.mxu0 %v1523_v15 }
 0x748   : > { %1595 = vmatpush.msra.mxu2 %v1516_v17  ;;  %1635 = vmatpush.msrb.mxu0 %v1514_v58 }
 0x74c   : > { %v2380_v56 = vpop.permute.xlu1 %2379 }
 0x74d   : > { %v2382_v59 = vunpack.i.h.bf16 %v2380_v56  ;;  %v2381_v11 = vunpack.i.l.bf16 %v2380_v56 }
 0x74f   : > { %v1507_v14 = vsel %vm596_vm10, %v1504_v20, %v2381_v11  ;;  %v1506_v41 = vsel %vm596_vm10, %v2381_v11, %v2382_v59  ;;  %v1505_v19 = vsel %vm596_vm10, %v2382_v59, %v1504_v20 }
 0x750   : > { %1596 = vmatpush.msra.mxu2 %v1507_v14  ;;  %1616 = vmatpush.msra.mxu3 %v1506_v41 }
 0x751   : > { %1636 = vmatpush.msrb.mxu0 %v1505_v19  ;;  %1952 = vmatmul.msk.f32.vlgmr.msra.gmra.mxu2 %vm677_vm11, %v1571_v24 }
 0x752   : > { %1953 = vmatmul.msk.f32.vlgmr.msra.gmra.mxu3 %vm677_vm11, %v1571_v24  ;;  %1954 = vmatmul.msk.f32.vlgmr.msrb.gmra.mxu0 %vm677_vm11, %v1571_v24 }
 0x7cf   : > { %v1638_v26 = vpop.f32.mrf.mxu0 }
 0x7d0   : > { %v1639_v33 = vadd.f32 %v1638_v26, %v1576_v46 }
 0x7d2   : > { %v1643_v42 = vmul.f32 %v3481_v30, %v1639_v33 }
 0x7d4   : > { %v3668_v13 = vmax.f32 %v1643_v42, 0.0  ;;  %v1598_v32 = vpop.f32.mrf.mxu2 }
 0x7d5   : > { %v1618_v29 = vpop.f32.mrf.mxu3  ;;  %v1599_v48 = vadd.f32 %v1598_v32, %v1576_v46 }
 0x7d6   : > { %1696 = vrot.lane.b32.xlu0 %v3668_v13, %s2631_s3  ;;  %1705 = vrot.lane.b32.xlu1 %v3668_v13, %s2632_s27  ;;  %v1619_v28 = vadd.f32 %v1618_v29, %v1576_v46 }
 0x7d7   : > { %1714 = vrot.lane.b32.xlu2 %v3668_v13, %s2633_s28  ;;  %v3677_v31 = vmul.f32 %v3469_v39, %v1599_v48 }
 0x7d8   : > { %v3680_v35 = vmul.f32 %v3472_v51, %v1619_v28 }
 0x7d9   : > { %v1644_v45 = vmax.f32 %v3677_v31, 0.0 }
 0x7da   : > { %v1645_v43 = vmax.f32 %v3680_v35, 0.0 }
 0x7dc   : > { %v2388_v34 = vpack.i.bf16 %v1645_v43, %v1644_v45 }
 0x7de   : > { %1669 = vrot.lane.b32.xlu0 %v3668_v13, %s2634_s14  ;;  %1678 = vrot.lane.b32.xlu1 %v3668_v13, %s2637_s20 }
 0x7df   : > { %1687 = vrot.lane.b32.xlu2 %v3668_v13, %s2636_s18 }
 0x7e6   : > { %2389 = vrot.lane.b32.xlu0 %v2388_v34, %s2632_s27  ;;  %2384 = vrot.lane.b32.xlu1 %v2388_v34, %s2633_s28 }
 0x7e7   : > { %2394 = vrot.lane.b32.xlu2 %v2388_v34, %s2631_s3  ;;  %s3746_s3 = scalar_lea.vmem [#allocation10], %s1968_s1  ;;  %s1969_s1 = smul.u32 48, %s2728_s25 }
 0x7ee   : > { %2404 = vrot.lane.b32.xlu0 %v2388_v34, %s2637_s20  ;;  %2399 = vrot.lane.b32.xlu1 %v2388_v34, %s2636_s18  ;;  %s1803_s18 = scalar_lea.sflag [#allocation4], %s2806_s29 }
 0x7ef   : > { %2409 = vrot.lane.b32.xlu2 %v2388_v34, %s2634_s14  ;;  %s1815_s14 = scalar_lea.hbm %s3855_s12, %s1969_s1 }
 0x7f0   : > { %s1818_s25 = sshll.u32 %s1815_s14, 4  ;;  %s1819_s25 = int_to_ptr.hbm [resolvable:$true] %s1818_s25 }
 0x7f1   : > { %s2564_s20 = sshra.s32 %s1819_s25, 4  ;;  %s2565_s20 = int_to_ptr.hbm [resolvable:$true] %s2564_s20 }
 0x7f2   : > { %p2571_p9 = scmp.lt.s32.totalorder %s2565_s20, %s3855_s12 }
 0x7f6   : > { %2419 = vrot.lane.b32.xlu0 %v2388_v34, %s2635_s13  ;;  %2414 = vrot.lane.b32.xlu1 %v2388_v34, %s2638_s26 }
 0x7f7   : > { %1660 = vrot.lane.b32.xlu2 %v3668_v13, %s2638_s26  ;;  %s2566_s26 = scalar_lea.hbm %s2565_s20, 48 }
 0x7f8   : > { %p2567_p1 = scmp.ne.s32.totalorder %s2565_s20, %s2566_s26  ;;  %p2572_p10 = scmp.lt.s32.totalorder %s2570_s30, %s2566_s26 }
 0x7fa   : > { %p2568_p4 = pnand %p2567_p1, %p2780_p7  ;;  %p2573_p2 = por %p2572_p10, %p2571_p9 }
 0x7fc   : > { %p2569_p8 = pneg %p2568_p4 }
 0x7fe   : > { %1723 = vperm.xlu0 %2342, %v1119_v50   ;;  %1651 = vrot.lane.b32.xlu1 %v3668_v13, %s2635_s13  ;;  %s1816_s13 = sshll.u32 %s3746_s3, 4  ;;  %p2574_p11 = pnand %p2573_p2, %p2569_p8  ;;  %s1817_s13 = int_to_ptr.vmem [resolvable:$true] %s1816_s13 }
 0x7ff   : > { %1122 = vperm.xlu2 %2100, %v1119_v50  }
 0x831   : > { %v1715_v23 = vpop.permute.xlu2 %1714 }
 0x839   : > { %v1688_v27 = vpop.permute.xlu2 %1687 }
 0x841   : > { %v2395_v61 = vpop.permute.xlu2 %2394 }
 0x842   : > { %v2397_v5 = vunpack.i.h.bf16 %v2395_v61  ;;  %v2396_v18 = vunpack.i.l.bf16 %v2395_v61 }
 0x844   : > { %v1699_v20 = vsel %vm646_vm5, %v2396_v18, %v2397_v5 }
 0x848   : > { %v1697_v49 = vpop.permute.xlu0 %1696  ;;  %v1706_v40 = vpop.permute.xlu1 %1705 }
 0x849   : > { %v3709_v57 = vpop.permute.xlu2 %2409  ;;  %v1698_v24 = vsel %vm646_vm5, %v2397_v5, %v1697_v49 }
 0x84a   : > { %v2412_v28 = vunpack.i.h.bf16 %v3709_v57  ;;  %v2411_v34 = vunpack.i.l.bf16 %v3709_v57 }
 0x850   : > { %v3711_v60 = vpop.permute.xlu0 %1669  ;;  %v3713_v62 = vpop.permute.xlu1 %1678 }
 0x851   : > { %v3715_v63 = vpop.permute.xlu2 %1660  ;;  %v1673_v35 = vsel %vm616_vm8, %v3711_v60, %v2411_v34  ;;  %v1671_v57 = vsel %vm616_vm8, %v2412_v28, %v3711_v60 }
 0x858   : > { %v2390_v44 = vpop.permute.xlu0 %2389  ;;  %v2385_v21 = vpop.permute.xlu1 %2384 }
 0x859   : > { %v1123_v0 = vpop.permute.xlu2 %1122  ;;  %v2392_v37 = vunpack.i.h.bf16 %v2390_v44  ;;  %v2391_v1 = vunpack.i.l.bf16 %v2390_v44  ;;  %v2387_v4 = vunpack.i.h.bf16 %v2385_v21  ;;  %v2386_v10 = vunpack.i.l.bf16 %v2385_v21 }
 0x85a   : > { %v1146_v2 = vadd.f32 %v3465_v36, %v1123_v0  ;;  %v1166_v8 = vadd.f32 %v3467_v47, %v1123_v0  ;;  %v1186_v16 = vadd.f32 %v3567_v38, %v1123_v0 }
 0x85b   : > { %v1717_v12 = vsel %vm666_vm3, %v2386_v10, %v2387_v4  ;;  %v1716_v7 = vsel %vm666_vm3, %v2387_v4, %v1715_v23  ;;  %v1718_v9 = vsel %vm666_vm3, %v1715_v23, %v2386_v10  ;;  %v1708_v47 = vsel %vm656_vm4, %v2391_v1, %v2392_v37 }
 0x85c   : > { %v1188_v15 = vmul.f32 %v3469_v39, %v1146_v2  ;;  %v1189_v17 = vmul.f32 %v3472_v51, %v1166_v8  ;;  %v1190_v36 = vmul.f32 %v3481_v30, %v1186_v16  ;;  %1736 = vmatpush.msrb.mxu1 %v1717_v12  ;;  %1756 = vmatpush.msrb.mxu2 %v1716_v7 }
 0x85d   : > { %1776 = vmatpush.msrb.mxu3 %v1718_v9  ;;  %v1707_v38 = vsel %vm656_vm4, %v2392_v37, %v1706_v40  ;;  %v1709_v58 = vsel %vm656_vm4, %v1706_v40, %v2391_v1 }
 0x85e   : > { %v1191_v56 = vadd.f32 %v1188_v15, %v3063_v52  ;;  %v1192_v59 = vadd.f32 %v1189_v17, %v3065_v53  ;;  %v1193_v11 = vadd.f32 %v1190_v36, %v3067_v55  ;;  %1737 = vmatpush.msrb.mxu1 %v1708_v47  ;;  %1757 = vmatpush.msrb.mxu2 %v1707_v38 }
 0x85f   : > { %1777 = vmatpush.msrb.mxu3 %v1709_v58  ;;  %v1700_v52 = vsel %vm646_vm5, %v1697_v49, %v2396_v18 }
 0x860   : > { %v1194_v14 = vmax.f32 %v1191_v56, 0.0  ;;  %v1195_v41 = vmax.f32 %v1192_v59, 0.0  ;;  %v1196_v19 = vmax.f32 %v1193_v11, 0.0  ;;  %v2405_v46 = vpop.permute.xlu0 %2404  ;;  %v2400_v26 = vpop.permute.xlu1 %2399  ;;  %1738 = vmatpush.msrb.mxu1 %v1699_v20  ;;  %1758 = vmatpush.msrb.mxu2 %v1698_v24 }
 0x861   : > { %v2402_v53 = vunpack.i.h.bf16 %v2400_v26  ;;  %v2401_v55 = vunpack.i.l.bf16 %v2400_v26  ;;  %1778 = vmatpush.msrb.mxu3 %v1700_v52  ;;  %v2407_v33 = vunpack.i.h.bf16 %v2405_v46  ;;  %v2406_v42 = vunpack.i.l.bf16 %v2405_v46 }
 0x862   : > { %1197 = vst [vmem:[%s3746_s3] sm:$0xff] %v1194_v14 }
 0x863   : > { %1198 = vst [vmem:[%s3746_s3 + $0x8] sm:$0xff] %v1195_v41  ;;  %v1690_v32 = vsel %vm636_vm6, %v2401_v55, %v2402_v53  ;;  %v1689_v29 = vsel %vm636_vm6, %v2402_v53, %v1688_v27  ;;  %v1691_v48 = vsel %vm636_vm6, %v1688_v27, %v2401_v55  ;;  %v1682_v50 = vsel %vm626_vm7, %v3713_v62, %v2406_v42 }
 0x864   : > { %1199 = vst [vmem:[%s3746_s3 + $0x10] sm:$0xff] %v1196_v19  ;;  %1739 = vmatpush.msrb.mxu1 %v1690_v32  ;;  %1759 = vmatpush.msrb.mxu2 %v1689_v29  ;;  %v1681_v23 = vsel %vm626_vm7, %v2406_v42, %v2407_v33  ;;  %v1680_v31 = vsel %vm626_vm7, %v2407_v33, %v3713_v62 }
 0x865   : > { %1779 = vmatpush.msrb.mxu3 %v1691_v48 }
 0x866   : > { %1740 = vmatpush.msrb.mxu1 %v1644_v45  ;;  %1760 = vmatpush.msrb.mxu2 %v1645_v43 }
 0x867   : > { %1780 = vmatpush.msrb.mxu3 %v3668_v13  ;;  %v1672_v13 = vsel %vm616_vm8, %v2411_v34, %v2412_v28 }
 0x868   : > { %v2420_v27 = vpop.permute.xlu0 %2419  ;;  %v2415_v61 = vpop.permute.xlu1 %2414  ;;  %1741 = vmatpush.msrb.mxu1 %v1682_v50  ;;  %1761 = vmatpush.msrb.mxu2 %v1681_v23 }
 0x869   : > { %v2422_v45 = vunpack.i.h.bf16 %v2420_v27  ;;  %v2421_v43 = vunpack.i.l.bf16 %v2420_v27  ;;  %v2417_v49 = vunpack.i.h.bf16 %v2415_v61  ;;  %v2416_v40 = vunpack.i.l.bf16 %v2415_v61  ;;  %1781 = vmatpush.msrb.mxu3 %v1680_v31 }
 0x86a   : > { %1742 = vmatpush.msrb.mxu1 %v1673_v35  ;;  %1762 = vmatpush.msrb.mxu2 %v1672_v13 }
 0x86b   : > { %1782 = vmatpush.msrb.mxu3 %v1671_v57  ;;  %v1664_v62 = vsel %vm606_vm9, %v3715_v63, %v2416_v40  ;;  %v1663_v44 = vsel %vm606_vm9, %v2416_v40, %v2417_v49  ;;  %v1662_v21 = vsel %vm606_vm9, %v2417_v49, %v3715_v63  ;;  %v1654_v0 = vsel %vm596_vm10, %v2421_v43, %v2422_v45 }
 0x86c   : > { %1743 = vmatpush.msrb.mxu1 %v1664_v62  ;;  %1763 = vmatpush.msrb.mxu2 %v1663_v44 }
 0x86d   : > { %1783 = vmatpush.msrb.mxu3 %v1662_v21 }
 0x86e   : > { %1764 = vmatpush.msrb.mxu2 %v1654_v0 }
 0x86f   : > { %1956 = vmatmul.msk.f32.vlgmr.msrb.gmra.mxu2 %vm677_vm11, %v3396_v3 }
 0x870   : > { %v1652_v60 = vpop.permute.xlu1 %1651  ;;  %v1724_v63 = vpop.permute.xlu0 %1723 }
 0x871   : > { %v1655_v37 = vsel %vm596_vm10, %v1652_v60, %v2421_v43  ;;  %v1653_v1 = vsel %vm596_vm10, %v2422_v45, %v1652_v60 }
 0x872   : > { %1744 = vmatpush.msrb.mxu1 %v1655_v37  ;;  %1784 = vmatpush.msrb.mxu3 %v1653_v1 }
 0x873   : > { %1955 = vmatmul.msk.f32.vlgmr.msrb.gmra.mxu1 %vm677_vm11, %v3396_v3  ;;  %1957 = vmatmul.msk.f32.vlgmr.msrb.gmra.mxu3 %vm677_vm11, %v3396_v3 }
 0x8f0   : > { %v1746_v4 = vpop.f32.mrf.mxu1 }
 0x8f1   : > { %v1747_v10 = vadd.f32 %v1746_v4, %v1724_v63 }
 0x8f2   : > { %v1766_v5 = vpop.f32.mrf.mxu2 }
 0x8f3   : > { %v1789_v2 = vmul.f32 %v3469_v39, %v1747_v10  ;;  %v1767_v8 = vadd.f32 %v1766_v5, %v1724_v63 }
 0x8f5   : > { %v1792_v54 = vadd.f32 %v1789_v2, %v3575_v6  ;;  %v1790_v16 = vmul.f32 %v3472_v51, %v1767_v8 }
 0x8f6   : > { %v1786_v18 = vpop.f32.mrf.mxu3 }
 0x8f7   : > { %v1795_v12 = vmax.f32 %v1792_v54, 0.0  ;;  %v1793_v3 = vadd.f32 %v1790_v16, %v3577_v22  ;;  %v1787_v7 = vadd.f32 %v1786_v18, %v1724_v63 }
 0x8f9   : > { %1958 = vst [vmem:[%s3746_s3 + $0x18] sm:$0xff] %v1795_v12  ;;  %v1796_v39 = vmax.f32 %v1793_v3, 0.0  ;;  %v1791_v9 = vmul.f32 %v3481_v30, %v1787_v7 }
 0x8fb   : > { %1959 = vst [vmem:[%s3746_s3 + $0x20] sm:$0xff] %v1796_v39  ;;  %v1794_v51 = vadd.f32 %v1791_v9, %v3579_v25 }
 0x8fd   : > { %v1797_v6 = vmax.f32 %v1794_v51, 0.0 }
 0x8ff   : > { %1960 = vst [vmem:[%s3746_s3 + $0x28] sm:$0xff] %v1797_v6 }
 0x900   : > { %2577 = shalt.err (!%p2574_p11)
}
 0x901   : > { %s2640_s29 = smov 384   ;;  %s2641_s24 = smov 24  }
 0x902   : > { %1984 = dma.vmem_to_hbm [thread:$0]  (%p2780_p7), %s1817_s13, 768, %s1819_s25, %s1803_s18, %s2640_s29, %s2640_s29, %s2641_s24  }
 0x903 PF: > { %s3878_s3 = sld [smem:[#allocation16_spill]]  ;;  %s1833_s1 = sand.u32 1, %s2612_s21  }
 0x904   : > { %s1834_s27 = scalar_lea.sflag [#allocation4], %s1833_s1 }
 0x909   : > { %p3879_p12 = scmp.ge.s32.totalorder %s3878_s3, 2 }
 0x90b   : > { %p2001_p13 = pnand %p3879_p12, %p2742_p6 }
 0x90d   : > { %p2002_p0 = pneg %p2001_p13 }
 0x90f   : > { %2607 = dma.done.wait (%p2002_p0), %s1834_s27, 768  }
 0x910   : > { %2609 = vsyncadd (%p2002_p0), %s1834_s27, 4294966528  ;;  %s3880_s24 = sld [smem:[#allocation18_spill]]  ;;  %s3883_s21 = smov %s2616_s22 }
 0x911   : > { %s3881_s28 = sld [smem:[#allocation15_spill]] }
 0x912   : > { %s3882_s23 = sld [smem:[#allocation19_spill]] }
 0x916   : > { %p27_p3 = scmp.ge.s32.totalorder %s3880_s24, 4  }
 0x917   : > { %s3884_s22 = smov %s3881_s28 }
 0x918   :  { %29 = sbr.rel (!%p27_p3) target bundleno = 11 (0xb), region = 126 }
 0x91d   :  { %1840 = vsyncpa [#allocation3], 1 }
 0x91e   :  { %1842 = vsyncpa [#allocation3 + $0x1], 1 }
 0x91f   :  { %1843 = vsyncpa [#allocation6], 1 }
 0x920   :  { %1844 = vsyncpa [#allocation9], 1 }
 0x921   :  { %1845 = vsyncpa [#allocation4], 1 }
 0x922   :  { %1847 = vsyncpa [#allocation4 + $0x1], 1 }

</bundles_post_ra>
